<compile_context>
chip_gen: v6e
topology: v6e:2x2x1
jax: 0.10.0
libtpu: 0.0.40
codegen_flags: <defaults>
</compile_context>

<pallas_src>
import jax
import jax.numpy as jnp
from jax.experimental import pallas as pl
from jax.experimental.pallas import tpu as pltpu


# ----------------------------- model dimensions -----------------------------
N_FEATS = 8            # feats (small synthetic size)
N_HIDDEN = 64          # self.lstm hidden size (dead code w.r.t. output, unused)
SEQ = 8                # number of timesteps in the example input
H2 = N_FEATS           # self.lstm2 hidden size == feats
G4 = 4 * H2            # gate width (i, f, g, o)
LANES = 128            # lane-dense slab / output width

# --------------------- slab row layout (8-sublane aligned) -------------------
ROW_WIH = 0            # rows [ 0,  8): W_ih2^T (F, 4H) in lanes [0, 4H)
ROW_WHH = 8            # rows [ 8, 16): W_hh2^T (H, 4H) in lanes [0, 4H)
ROW_FCW = 16           # rows [16, 24): fcn W^T (F, F)  in lanes [0, F)
ROW_B = 24             # 1 row: b_ih2 + b_hh2 (4H,)
ROW_FCB = 25           # 1 row: fcn bias (F,)
ROW_H0 = 26            # 1 row: h0 of lstm2 (H,)
ROW_C0 = 27            # 1 row: c0 of lstm2 (H,)
ROW_X = 32             # rows [32, 32+SEQ): x (seq, F) in lanes [0, F)
SLAB_ROWS = ROW_X + SEQ  # 40


# --------------------------------- kernel -----------------------------------
def lstm_ad_kernel(slab_ref, out_ref, h_scratch):
    seq = out_ref.shape[0]
    h_dim = H2
    feats = N_FEATS

    # Parameter / state loads (all slices start on 8-sublane boundaries).
    w_ih = slab_ref[ROW_WIH:ROW_WIH + feats, :]            # (F, 128), lanes >= 4H are 0
    bias = slab_ref[ROW_B:ROW_B + 1, :]                    # (1, 128)
    fcn_w = slab_ref[ROW_FCW:ROW_FCW + feats, :]           # (F, 128), lanes >= F are 0
    fcn_b = slab_ref[ROW_FCB:ROW_FCB + 1, :]               # (1, 128)
    x = slab_ref[ROW_X:ROW_X + seq, 0:feats]               # (seq, F)
    h = slab_ref[ROW_H0:ROW_H0 + 1, 0:h_dim]               # (1, H)
    c = slab_ref[ROW_C0:ROW_C0 + 1, 0:h_dim]               # (1, H)

    # W_hh rows, loaded once before the recurrence (used as VPU MAC operands).
    whh_rows = [slab_ref[ROW_WHH + k:ROW_WHH + k + 1, :] for k in range(h_dim)]

    # ONE fused MXU call for every timestep's input->gate projection (+ bias).
    xg = jnp.dot(x, w_ih, preferred_element_type=jnp.float32) + bias   # (seq, 128)

    for t in range(seq):                                   # static unroll (seq is small)
        # Recurrent projection h @ W_hh as VPU broadcast-MACs (no per-step MXU):
        #   gates_rec[j] = sum_k h[k] * w_hh[k, j]
        terms = [h[:, k:k + 1] * whh_rows[k] for k in range(h_dim)]     # 8 x (1,128)
        while len(terms) > 1:                              # pairwise tree sum
            nxt = [terms[i] + terms[i + 1] for i in range(0, len(terms) - 1, 2)]
            if len(terms) % 2:
                nxt.append(terms[-1])
            terms = nxt
        gates = xg[t:t + 1, :] + terms[0]                  # (1, 128)

        # Fused activations: one sigmoid push + one tanh push on the full vreg,
        # then slice the i/f/g/o lane ranges (PyTorch gate order: i, f, g, o).
        sig = jax.nn.sigmoid(gates)
        tah = jnp.tanh(gates)
        i_g = sig[:, 0:h_dim]
        f_g = sig[:, h_dim:2 * h_dim]
        g_g = tah[:, 2 * h_dim:3 * h_dim]
        o_g = sig[:, 3 * h_dim:4 * h_dim]

        c = f_g * c + i_g * g_g
        h = o_g * jnp.tanh(c)
        h_scratch[t:t + 1, :] = h                          # park h_t, fcn comes later

    # fcn hoisted out of the recurrence: one (seq,H)@(H,128) MXU matmul,
    # one sigmoid, one *2, one unmasked lane-dense store.
    hs = h_scratch[...]                                    # (seq, H)
    y = jnp.dot(hs, fcn_w, preferred_element_type=jnp.float32) + fcn_b  # (seq, 128)
    # Lanes >= F of y are 0 -> 2*sigmoid(0) = 1.0 junk; the wrapper slices them off.
    out_ref[...] = 2.0 * jax.nn.sigmoid(y)


# ------------------------------- host wrappers -------------------------------
def pack_slab(params, h0, c0, x):
    slab = jnp.zeros((SLAB_ROWS, LANES), jnp.float32)
    slab = slab.at[ROW_WIH:ROW_WIH + N_FEATS, :G4].set(params["w_ih2"])
    slab = slab.at[ROW_WHH:ROW_WHH + H2, :G4].set(params["w_hh2"])
    slab = slab.at[ROW_FCW:ROW_FCW + N_FEATS, :N_FEATS].set(params["fcn_w"])
    slab = slab.at[ROW_B, :G4].set(params["b2"])
    slab = slab.at[ROW_FCB, :N_FEATS].set(params["fcn_b"])
    slab = slab.at[ROW_H0, :H2].set(h0.reshape(-1))
    slab = slab.at[ROW_C0, :H2].set(c0.reshape(-1))
    slab = slab.at[ROW_X:ROW_X + SEQ, :N_FEATS].set(x)
    return slab


@jax.jit
def lstm_ad_forward(x, params, h0, c0):
    """x: (seq, feats) f32. Returns (seq, feats) = 2 * sigmoid(Linear(lstm2(x)))."""
    x = x.astype(jnp.float32)
    slab = pack_slab(params, h0, c0, x)                    # fused under jit

    vmem = pl.BlockSpec(memory_space=pltpu.MemorySpace.VMEM)
    out = pl.pallas_call(
        lstm_ad_kernel,
        out_shape=jax.ShapeDtypeStruct((SEQ, LANES), jnp.float32),
        in_specs=[vmem],
        out_specs=vmem,
        scratch_shapes=[pltpu.VMEM((SEQ, H2), jnp.float32)],
    )(slab)
    # Output lanes >= N_FEATS hold 2*sigmoid(0) = 1.0 junk -> sliced off here.
    return out[:, :N_FEATS]


def init_params(key):
    """PyTorch-style uniform(-1/sqrt(fan), 1/sqrt(fan)) init for lstm2 + fcn.

    Weights are stored transposed ((in, out)) so the kernel computes y = x @ W + b,
    equivalent to PyTorch's x @ W.T + b.
    """
    k1, k2, k3, k4, k5, k6 = jax.random.split(key, 6)
    bound_l = 1.0 / jnp.sqrt(jnp.float32(H2))          # LSTM bound: 1/sqrt(hidden)
    w_ih2 = jax.random.uniform(k1, (N_FEATS, G4), jnp.float32, -bound_l, bound_l)
    w_hh2 = jax.random.uniform(k2, (H2, G4), jnp.float32, -bound_l, bound_l)
    b_ih2 = jax.random.uniform(k3, (G4,), jnp.float32, -bound_l, bound_l)
    b_hh2 = jax.random.uniform(k4, (G4,), jnp.float32, -bound_l, bound_l)
    bound_f = 1.0 / jnp.sqrt(jnp.float32(N_FEATS))     # Linear bound: 1/sqrt(in)
    fcn_w = jax.random.uniform(k5, (N_FEATS, N_FEATS), jnp.float32, -bound_f, bound_f)
    fcn_b = jax.random.uniform(k6, (N_FEATS,), jnp.float32, -bound_f, bound_f)
    return dict(w_ih2=w_ih2, w_hh2=w_hh2, b2=b_ih2 + b_hh2, fcn_w=fcn_w, fcn_b=fcn_b)


def reference_forward(x, params, h0, c0):
    """Pure-JAX reference of the same math (outside Pallas)."""
    h = h0.reshape(1, H2)
    c = c0.reshape(1, H2)
    b = params["b2"].reshape(1, -1)
    fcn_b = params["fcn_b"].reshape(1, -1)
    outs = []
    for t in range(x.shape[0]):
        gates = x[t:t + 1, :] @ params["w_ih2"] + b + h @ params["w_hh2"]
        i_g = jax.nn.sigmoid(gates[:, 0:H2])
        f_g = jax.nn.sigmoid(gates[:, H2:2 * H2])
        g_g = jnp.tanh(gates[:, 2 * H2:3 * H2])
        o_g = jax.nn.sigmoid(gates[:, 3 * H2:4 * H2])
        c = f_g * c + i_g * g_g
        h = o_g * jnp.tanh(c)
        outs.append(2.0 * jax.nn.sigmoid(h @ params["fcn_w"] + fcn_b))
    return jnp.concatenate(outs, axis=0)


if __name__ == "__main__":
    key = jax.random.PRNGKey(0)
    k_x, k_p, k_h, k_c = jax.random.split(key, 4)

    x = jax.random.uniform(k_x, (SEQ, N_FEATS), jnp.float32)     # input sequence
    params = init_params(k_p)
    h0 = jax.random.uniform(k_h, (H2,), jnp.float32)             # torch.rand  h0 (lstm2)
    c0 = jax.random.normal(k_c, (H2,), jnp.float32)              # torch.randn c0 (lstm2)

    out = lstm_ad_forward(x, params, h0, c0)
    jax.block_until_ready(out)

    ref = reference_forward(x, params, h0, c0)
    assert out.shape == (SEQ, N_FEATS)
    assert jnp.allclose(out, ref, atol=1e-5)

    print("KERNEL_OK")
</pallas_src>

<mosaic_0001>
module attributes {stable_mosaic.version = 11 : i64} {
  func.func @lstm_ad_kernel(%arg0: memref<40x128xf32, #tpu.memory_space<vmem>>, %arg1: memref<8x128xf32, #tpu.memory_space<vmem>>, %arg2: memref<8x8xf32, #tpu.memory_space<vmem>>) attributes {dimension_semantics = [], scalar_prefetch = 0 : i64, scratch_operands = 1 : i64, tpu.core_type = #tpu.core_type<tc>} {
    %c0 = arith.constant 0 : index
    %c0_0 = arith.constant 0 : index
    %0 = vector.load %arg0[%c0, %c0_0] : memref<40x128xf32, #tpu.memory_space<vmem>>, vector<8x128xf32>
    %c24 = arith.constant 24 : index
    %c0_1 = arith.constant 0 : index
    %1 = vector.load %arg0[%c24, %c0_1] : memref<40x128xf32, #tpu.memory_space<vmem>>, vector<1x128xf32>
    %c16 = arith.constant 16 : index
    %c0_2 = arith.constant 0 : index
    %2 = vector.load %arg0[%c16, %c0_2] : memref<40x128xf32, #tpu.memory_space<vmem>>, vector<8x128xf32>
    %c25 = arith.constant 25 : index
    %c0_3 = arith.constant 0 : index
    %3 = vector.load %arg0[%c25, %c0_3] : memref<40x128xf32, #tpu.memory_space<vmem>>, vector<1x128xf32>
    %c32 = arith.constant 32 : index
    %c0_4 = arith.constant 0 : index
    %4 = vector.load %arg0[%c32, %c0_4] : memref<40x128xf32, #tpu.memory_space<vmem>>, vector<8x8xf32>
    %c26 = arith.constant 26 : index
    %c0_5 = arith.constant 0 : index
    %5 = vector.load %arg0[%c26, %c0_5] : memref<40x128xf32, #tpu.memory_space<vmem>>, vector<1x8xf32>
    %c27 = arith.constant 27 : index
    %c0_6 = arith.constant 0 : index
    %6 = vector.load %arg0[%c27, %c0_6] : memref<40x128xf32, #tpu.memory_space<vmem>>, vector<1x8xf32>
    %c8 = arith.constant 8 : index
    %c0_7 = arith.constant 0 : index
    %7 = vector.load %arg0[%c8, %c0_7] : memref<40x128xf32, #tpu.memory_space<vmem>>, vector<1x128xf32>
    %c9 = arith.constant 9 : index
    %c0_8 = arith.constant 0 : index
    %8 = vector.load %arg0[%c9, %c0_8] : memref<40x128xf32, #tpu.memory_space<vmem>>, vector<1x128xf32>
    %c10 = arith.constant 10 : index
    %c0_9 = arith.constant 0 : index
    %9 = vector.load %arg0[%c10, %c0_9] : memref<40x128xf32, #tpu.memory_space<vmem>>, vector<1x128xf32>
    %c11 = arith.constant 11 : index
    %c0_10 = arith.constant 0 : index
    %10 = vector.load %arg0[%c11, %c0_10] : memref<40x128xf32, #tpu.memory_space<vmem>>, vector<1x128xf32>
    %c12 = arith.constant 12 : index
    %c0_11 = arith.constant 0 : index
    %11 = vector.load %arg0[%c12, %c0_11] : memref<40x128xf32, #tpu.memory_space<vmem>>, vector<1x128xf32>
    %c13 = arith.constant 13 : index
    %c0_12 = arith.constant 0 : index
    %12 = vector.load %arg0[%c13, %c0_12] : memref<40x128xf32, #tpu.memory_space<vmem>>, vector<1x128xf32>
    %c14 = arith.constant 14 : index
    %c0_13 = arith.constant 0 : index
    %13 = vector.load %arg0[%c14, %c0_13] : memref<40x128xf32, #tpu.memory_space<vmem>>, vector<1x128xf32>
    %c15 = arith.constant 15 : index
    %c0_14 = arith.constant 0 : index
    %14 = vector.load %arg0[%c15, %c0_14] : memref<40x128xf32, #tpu.memory_space<vmem>>, vector<1x128xf32>
    %cst = arith.constant dense<0.000000e+00> : vector<8x128xf32>
    %15 = tpu.matmul %4, %0, %cst {dimension_numbers = #tpu.dot_dimension_numbers<[1], [0], [0], [1], [0, 0, 1, 1], [], []>} : vector<8x8xf32>, vector<8x128xf32>, vector<8x128xf32> -> vector<8x128xf32>
    %16 = vector.broadcast %1 : vector<1x128xf32> to vector<8x128xf32>
    %17 = arith.addf %15, %16 : vector<8x128xf32>
    %18 = vector.extract_strided_slice %5 {offsets = [0, 0], sizes = [1, 1], strides = [1, 1]} : vector<1x8xf32> to vector<1x1xf32>
    %19 = vector.broadcast %18 : vector<1x1xf32> to vector<1x128xf32>
    %20 = arith.mulf %19, %7 : vector<1x128xf32>
    %21 = vector.extract_strided_slice %5 {offsets = [0, 1], sizes = [1, 1], strides = [1, 1]} : vector<1x8xf32> to vector<1x1xf32>
    %22 = vector.broadcast %21 : vector<1x1xf32> to vector<1x128xf32>
    %23 = arith.mulf %22, %8 : vector<1x128xf32>
    %24 = vector.extract_strided_slice %5 {offsets = [0, 2], sizes = [1, 1], strides = [1, 1]} : vector<1x8xf32> to vector<1x1xf32>
    %25 = vector.broadcast %24 : vector<1x1xf32> to vector<1x128xf32>
    %26 = arith.mulf %25, %9 : vector<1x128xf32>
    %27 = vector.extract_strided_slice %5 {offsets = [0, 3], sizes = [1, 1], strides = [1, 1]} : vector<1x8xf32> to vector<1x1xf32>
    %28 = vector.broadcast %27 : vector<1x1xf32> to vector<1x128xf32>
    %29 = arith.mulf %28, %10 : vector<1x128xf32>
    %30 = vector.extract_strided_slice %5 {offsets = [0, 4], sizes = [1, 1], strides = [1, 1]} : vector<1x8xf32> to vector<1x1xf32>
    %31 = vector.broadcast %30 : vector<1x1xf32> to vector<1x128xf32>
    %32 = arith.mulf %31, %11 : vector<1x128xf32>
    %33 = vector.extract_strided_slice %5 {offsets = [0, 5], sizes = [1, 1], strides = [1, 1]} : vector<1x8xf32> to vector<1x1xf32>
    %34 = vector.broadcast %33 : vector<1x1xf32> to vector<1x128xf32>
    %35 = arith.mulf %34, %12 : vector<1x128xf32>
    %36 = vector.extract_strided_slice %5 {offsets = [0, 6], sizes = [1, 1], strides = [1, 1]} : vector<1x8xf32> to vector<1x1xf32>
    %37 = vector.broadcast %36 : vector<1x1xf32> to vector<1x128xf32>
    %38 = arith.mulf %37, %13 : vector<1x128xf32>
    %39 = vector.extract_strided_slice %5 {offsets = [0, 7], sizes = [1, 1], strides = [1, 1]} : vector<1x8xf32> to vector<1x1xf32>
    %40 = vector.broadcast %39 : vector<1x1xf32> to vector<1x128xf32>
    %41 = arith.mulf %40, %14 : vector<1x128xf32>
    %42 = arith.addf %20, %23 : vector<1x128xf32>
    %43 = arith.addf %26, %29 : vector<1x128xf32>
    %44 = arith.addf %32, %35 : vector<1x128xf32>
    %45 = arith.addf %38, %41 : vector<1x128xf32>
    %46 = arith.addf %42, %43 : vector<1x128xf32>
    %47 = arith.addf %44, %45 : vector<1x128xf32>
    %48 = arith.addf %46, %47 : vector<1x128xf32>
    %49 = vector.extract_strided_slice %17 {offsets = [0, 0], sizes = [1, 128], strides = [1, 1]} : vector<8x128xf32> to vector<1x128xf32>
    %50 = arith.addf %49, %48 : vector<1x128xf32>
    %51 = arith.negf %50 : vector<1x128xf32>
    %52 = math.exp %51 : vector<1x128xf32>
    %cst_15 = arith.constant 1.000000e+00 : f32
    %53 = vector.broadcast %cst_15 : f32 to vector<1x128xf32>
    %54 = arith.addf %53, %52 : vector<1x128xf32>
    %55 = arith.divf %53, %54 : vector<1x128xf32>
    %56 = math.tanh %50 : vector<1x128xf32>
    %57 = vector.extract_strided_slice %55 {offsets = [0, 0], sizes = [1, 8], strides = [1, 1]} : vector<1x128xf32> to vector<1x8xf32>
    %58 = vector.extract_strided_slice %55 {offsets = [0, 8], sizes = [1, 8], strides = [1, 1]} : vector<1x128xf32> to vector<1x8xf32>
    %59 = vector.extract_strided_slice %56 {offsets = [0, 16], sizes = [1, 8], strides = [1, 1]} : vector<1x128xf32> to vector<1x8xf32>
    %60 = vector.extract_strided_slice %55 {offsets = [0, 24], sizes = [1, 8], strides = [1, 1]} : vector<1x128xf32> to vector<1x8xf32>
    %61 = arith.mulf %58, %6 : vector<1x8xf32>
    %62 = arith.mulf %57, %59 : vector<1x8xf32>
    %63 = arith.addf %61, %62 : vector<1x8xf32>
    %64 = math.tanh %63 : vector<1x8xf32>
    %65 = arith.mulf %60, %64 : vector<1x8xf32>
    %c0_16 = arith.constant 0 : index
    %c0_17 = arith.constant 0 : index
    %66 = vector.load %arg2[%c0_16, %c0_17] : memref<8x8xf32, #tpu.memory_space<vmem>>, vector<1x8xf32>
    tpu.vector_store %arg2[%c0_16, %c0_17], %65 {strides = array<i32>} : memref<8x8xf32, #tpu.memory_space<vmem>>, vector<1x8xf32>,
    %67 = vector.extract_strided_slice %65 {offsets = [0, 0], sizes = [1, 1], strides = [1, 1]} : vector<1x8xf32> to vector<1x1xf32>
    %68 = vector.broadcast %67 : vector<1x1xf32> to vector<1x128xf32>
    %69 = arith.mulf %68, %7 : vector<1x128xf32>
    %70 = vector.extract_strided_slice %65 {offsets = [0, 1], sizes = [1, 1], strides = [1, 1]} : vector<1x8xf32> to vector<1x1xf32>
    %71 = vector.broadcast %70 : vector<1x1xf32> to vector<1x128xf32>
    %72 = arith.mulf %71, %8 : vector<1x128xf32>
    %73 = vector.extract_strided_slice %65 {offsets = [0, 2], sizes = [1, 1], strides = [1, 1]} : vector<1x8xf32> to vector<1x1xf32>
    %74 = vector.broadcast %73 : vector<1x1xf32> to vector<1x128xf32>
    %75 = arith.mulf %74, %9 : vector<1x128xf32>
    %76 = vector.extract_strided_slice %65 {offsets = [0, 3], sizes = [1, 1], strides = [1, 1]} : vector<1x8xf32> to vector<1x1xf32>
    %77 = vector.broadcast %76 : vector<1x1xf32> to vector<1x128xf32>
    %78 = arith.mulf %77, %10 : vector<1x128xf32>
    %79 = vector.extract_strided_slice %65 {offsets = [0, 4], sizes = [1, 1], strides = [1, 1]} : vector<1x8xf32> to vector<1x1xf32>
    %80 = vector.broadcast %79 : vector<1x1xf32> to vector<1x128xf32>
    %81 = arith.mulf %80, %11 : vector<1x128xf32>
    %82 = vector.extract_strided_slice %65 {offsets = [0, 5], sizes = [1, 1], strides = [1, 1]} : vector<1x8xf32> to vector<1x1xf32>
    %83 = vector.broadcast %82 : vector<1x1xf32> to vector<1x128xf32>
    %84 = arith.mulf %83, %12 : vector<1x128xf32>
    %85 = vector.extract_strided_slice %65 {offsets = [0, 6], sizes = [1, 1], strides = [1, 1]} : vector<1x8xf32> to vector<1x1xf32>
    %86 = vector.broadcast %85 : vector<1x1xf32> to vector<1x128xf32>
    %87 = arith.mulf %86, %13 : vector<1x128xf32>
    %88 = vector.extract_strided_slice %65 {offsets = [0, 7], sizes = [1, 1], strides = [1, 1]} : vector<1x8xf32> to vector<1x1xf32>
    %89 = vector.broadcast %88 : vector<1x1xf32> to vector<1x128xf32>
    %90 = arith.mulf %89, %14 : vector<1x128xf32>
    %91 = arith.addf %69, %72 : vector<1x128xf32>
    %92 = arith.addf %75, %78 : vector<1x128xf32>
    %93 = arith.addf %81, %84 : vector<1x128xf32>
    %94 = arith.addf %87, %90 : vector<1x128xf32>
    %95 = arith.addf %91, %92 : vector<1x128xf32>
    %96 = arith.addf %93, %94 : vector<1x128xf32>
    %97 = arith.addf %95, %96 : vector<1x128xf32>
    %98 = vector.extract_strided_slice %17 {offsets = [1, 0], sizes = [1, 128], strides = [1, 1]} : vector<8x128xf32> to vector<1x128xf32>
    %99 = arith.addf %98, %97 : vector<1x128xf32>
    %100 = arith.negf %99 : vector<1x128xf32>
    %101 = math.exp %100 : vector<1x128xf32>
    %cst_18 = arith.constant 1.000000e+00 : f32
    %102 = vector.broadcast %cst_18 : f32 to vector<1x128xf32>
    %103 = arith.addf %102, %101 : vector<1x128xf32>
    %104 = arith.divf %102, %103 : vector<1x128xf32>
    %105 = math.tanh %99 : vector<1x128xf32>
    %106 = vector.extract_strided_slice %104 {offsets = [0, 0], sizes = [1, 8], strides = [1, 1]} : vector<1x128xf32> to vector<1x8xf32>
    %107 = vector.extract_strided_slice %104 {offsets = [0, 8], sizes = [1, 8], strides = [1, 1]} : vector<1x128xf32> to vector<1x8xf32>
    %108 = vector.extract_strided_slice %105 {offsets = [0, 16], sizes = [1, 8], strides = [1, 1]} : vector<1x128xf32> to vector<1x8xf32>
    %109 = vector.extract_strided_slice %104 {offsets = [0, 24], sizes = [1, 8], strides = [1, 1]} : vector<1x128xf32> to vector<1x8xf32>
    %110 = arith.mulf %107, %63 : vector<1x8xf32>
    %111 = arith.mulf %106, %108 : vector<1x8xf32>
    %112 = arith.addf %110, %111 : vector<1x8xf32>
    %113 = math.tanh %112 : vector<1x8xf32>
    %114 = arith.mulf %109, %113 : vector<1x8xf32>
    %c1 = arith.constant 1 : index
    %c0_19 = arith.constant 0 : index
    %115 = vector.load %arg2[%c1, %c0_19] : memref<8x8xf32, #tpu.memory_space<vmem>>, vector<1x8xf32>
    tpu.vector_store %arg2[%c1, %c0_19], %114 {strides = array<i32>} : memref<8x8xf32, #tpu.memory_space<vmem>>, vector<1x8xf32>,
    %116 = vector.extract_strided_slice %114 {offsets = [0, 0], sizes = [1, 1], strides = [1, 1]} : vector<1x8xf32> to vector<1x1xf32>
    %117 = vector.broadcast %116 : vector<1x1xf32> to vector<1x128xf32>
    %118 = arith.mulf %117, %7 : vector<1x128xf32>
    %119 = vector.extract_strided_slice %114 {offsets = [0, 1], sizes = [1, 1], strides = [1, 1]} : vector<1x8xf32> to vector<1x1xf32>
    %120 = vector.broadcast %119 : vector<1x1xf32> to vector<1x128xf32>
    %121 = arith.mulf %120, %8 : vector<1x128xf32>
    %122 = vector.extract_strided_slice %114 {offsets = [0, 2], sizes = [1, 1], strides = [1, 1]} : vector<1x8xf32> to vector<1x1xf32>
    %123 = vector.broadcast %122 : vector<1x1xf32> to vector<1x128xf32>
    %124 = arith.mulf %123, %9 : vector<1x128xf32>
    %125 = vector.extract_strided_slice %114 {offsets = [0, 3], sizes = [1, 1], strides = [1, 1]} : vector<1x8xf32> to vector<1x1xf32>
    %126 = vector.broadcast %125 : vector<1x1xf32> to vector<1x128xf32>
    %127 = arith.mulf %126, %10 : vector<1x128xf32>
    %128 = vector.extract_strided_slice %114 {offsets = [0, 4], sizes = [1, 1], strides = [1, 1]} : vector<1x8xf32> to vector<1x1xf32>
    %129 = vector.broadcast %128 : vector<1x1xf32> to vector<1x128xf32>
    %130 = arith.mulf %129, %11 : vector<1x128xf32>
    %131 = vector.extract_strided_slice %114 {offsets = [0, 5], sizes = [1, 1], strides = [1, 1]} : vector<1x8xf32> to vector<1x1xf32>
    %132 = vector.broadcast %131 : vector<1x1xf32> to vector<1x128xf32>
    %133 = arith.mulf %132, %12 : vector<1x128xf32>
    %134 = vector.extract_strided_slice %114 {offsets = [0, 6], sizes = [1, 1], strides = [1, 1]} : vector<1x8xf32> to vector<1x1xf32>
    %135 = vector.broadcast %134 : vector<1x1xf32> to vector<1x128xf32>
    %136 = arith.mulf %135, %13 : vector<1x128xf32>
    %137 = vector.extract_strided_slice %114 {offsets = [0, 7], sizes = [1, 1], strides = [1, 1]} : vector<1x8xf32> to vector<1x1xf32>
    %138 = vector.broadcast %137 : vector<1x1xf32> to vector<1x128xf32>
    %139 = arith.mulf %138, %14 : vector<1x128xf32>
    %140 = arith.addf %118, %121 : vector<1x128xf32>
    %141 = arith.addf %124, %127 : vector<1x128xf32>
    %142 = arith.addf %130, %133 : vector<1x128xf32>
    %143 = arith.addf %136, %139 : vector<1x128xf32>
    %144 = arith.addf %140, %141 : vector<1x128xf32>
    %145 = arith.addf %142, %143 : vector<1x128xf32>
    %146 = arith.addf %144, %145 : vector<1x128xf32>
    %147 = vector.extract_strided_slice %17 {offsets = [2, 0], sizes = [1, 128], strides = [1, 1]} : vector<8x128xf32> to vector<1x128xf32>
    %148 = arith.addf %147, %146 : vector<1x128xf32>
    %149 = arith.negf %148 : vector<1x128xf32>
    %150 = math.exp %149 : vector<1x128xf32>
    %cst_20 = arith.constant 1.000000e+00 : f32
    %151 = vector.broadcast %cst_20 : f32 to vector<1x128xf32>
    %152 = arith.addf %151, %150 : vector<1x128xf32>
    %153 = arith.divf %151, %152 : vector<1x128xf32>
    %154 = math.tanh %148 : vector<1x128xf32>
    %155 = vector.extract_strided_slice %153 {offsets = [0, 0], sizes = [1, 8], strides = [1, 1]} : vector<1x128xf32> to vector<1x8xf32>
    %156 = vector.extract_strided_slice %153 {offsets = [0, 8], sizes = [1, 8], strides = [1, 1]} : vector<1x128xf32> to vector<1x8xf32>
    %157 = vector.extract_strided_slice %154 {offsets = [0, 16], sizes = [1, 8], strides = [1, 1]} : vector<1x128xf32> to vector<1x8xf32>
    %158 = vector.extract_strided_slice %153 {offsets = [0, 24], sizes = [1, 8], strides = [1, 1]} : vector<1x128xf32> to vector<1x8xf32>
    %159 = arith.mulf %156, %112 : vector<1x8xf32>
    %160 = arith.mulf %155, %157 : vector<1x8xf32>
    %161 = arith.addf %159, %160 : vector<1x8xf32>
    %162 = math.tanh %161 : vector<1x8xf32>
    %163 = arith.mulf %158, %162 : vector<1x8xf32>
    %c2 = arith.constant 2 : index
    %c0_21 = arith.constant 0 : index
    %164 = vector.load %arg2[%c2, %c0_21] : memref<8x8xf32, #tpu.memory_space<vmem>>, vector<1x8xf32>
    tpu.vector_store %arg2[%c2, %c0_21], %163 {strides = array<i32>} : memref<8x8xf32, #tpu.memory_space<vmem>>, vector<1x8xf32>,
    %165 = vector.extract_strided_slice %163 {offsets = [0, 0], sizes = [1, 1], strides = [1, 1]} : vector<1x8xf32> to vector<1x1xf32>
    %166 = vector.broadcast %165 : vector<1x1xf32> to vector<1x128xf32>
    %167 = arith.mulf %166, %7 : vector<1x128xf32>
    %168 = vector.extract_strided_slice %163 {offsets = [0, 1], sizes = [1, 1], strides = [1, 1]} : vector<1x8xf32> to vector<1x1xf32>
    %169 = vector.broadcast %168 : vector<1x1xf32> to vector<1x128xf32>
    %170 = arith.mulf %169, %8 : vector<1x128xf32>
    %171 = vector.extract_strided_slice %163 {offsets = [0, 2], sizes = [1, 1], strides = [1, 1]} : vector<1x8xf32> to vector<1x1xf32>
    %172 = vector.broadcast %171 : vector<1x1xf32> to vector<1x128xf32>
    %173 = arith.mulf %172, %9 : vector<1x128xf32>
    %174 = vector.extract_strided_slice %163 {offsets = [0, 3], sizes = [1, 1], strides = [1, 1]} : vector<1x8xf32> to vector<1x1xf32>
    %175 = vector.broadcast %174 : vector<1x1xf32> to vector<1x128xf32>
    %176 = arith.mulf %175, %10 : vector<1x128xf32>
    %177 = vector.extract_strided_slice %163 {offsets = [0, 4], sizes = [1, 1], strides = [1, 1]} : vector<1x8xf32> to vector<1x1xf32>
    %178 = vector.broadcast %177 : vector<1x1xf32> to vector<1x128xf32>
    %179 = arith.mulf %178, %11 : vector<1x128xf32>
    %180 = vector.extract_strided_slice %163 {offsets = [0, 5], sizes = [1, 1], strides = [1, 1]} : vector<1x8xf32> to vector<1x1xf32>
    %181 = vector.broadcast %180 : vector<1x1xf32> to vector<1x128xf32>
    %182 = arith.mulf %181, %12 : vector<1x128xf32>
    %183 = vector.extract_strided_slice %163 {offsets = [0, 6], sizes = [1, 1], strides = [1, 1]} : vector<1x8xf32> to vector<1x1xf32>
    %184 = vector.broadcast %183 : vector<1x1xf32> to vector<1x128xf32>
    %185 = arith.mulf %184, %13 : vector<1x128xf32>
    %186 = vector.extract_strided_slice %163 {offsets = [0, 7], sizes = [1, 1], strides = [1, 1]} : vector<1x8xf32> to vector<1x1xf32>
    %187 = vector.broadcast %186 : vector<1x1xf32> to vector<1x128xf32>
    %188 = arith.mulf %187, %14 : vector<1x128xf32>
    %189 = arith.addf %167, %170 : vector<1x128xf32>
    %190 = arith.addf %173, %176 : vector<1x128xf32>
    %191 = arith.addf %179, %182 : vector<1x128xf32>
    %192 = arith.addf %185, %188 : vector<1x128xf32>
    %193 = arith.addf %189, %190 : vector<1x128xf32>
    %194 = arith.addf %191, %192 : vector<1x128xf32>
    %195 = arith.addf %193, %194 : vector<1x128xf32>
    %196 = vector.extract_strided_slice %17 {offsets = [3, 0], sizes = [1, 128], strides = [1, 1]} : vector<8x128xf32> to vector<1x128xf32>
    %197 = arith.addf %196, %195 : vector<1x128xf32>
    %198 = arith.negf %197 : vector<1x128xf32>
    %199 = math.exp %198 : vector<1x128xf32>
    %cst_22 = arith.constant 1.000000e+00 : f32
    %200 = vector.broadcast %cst_22 : f32 to vector<1x128xf32>
    %201 = arith.addf %200, %199 : vector<1x128xf32>
    %202 = arith.divf %200, %201 : vector<1x128xf32>
    %203 = math.tanh %197 : vector<1x128xf32>
    %204 = vector.extract_strided_slice %202 {offsets = [0, 0], sizes = [1, 8], strides = [1, 1]} : vector<1x128xf32> to vector<1x8xf32>
    %205 = vector.extract_strided_slice %202 {offsets = [0, 8], sizes = [1, 8], strides = [1, 1]} : vector<1x128xf32> to vector<1x8xf32>
    %206 = vector.extract_strided_slice %203 {offsets = [0, 16], sizes = [1, 8], strides = [1, 1]} : vector<1x128xf32> to vector<1x8xf32>
    %207 = vector.extract_strided_slice %202 {offsets = [0, 24], sizes = [1, 8], strides = [1, 1]} : vector<1x128xf32> to vector<1x8xf32>
    %208 = arith.mulf %205, %161 : vector<1x8xf32>
    %209 = arith.mulf %204, %206 : vector<1x8xf32>
    %210 = arith.addf %208, %209 : vector<1x8xf32>
    %211 = math.tanh %210 : vector<1x8xf32>
    %212 = arith.mulf %207, %211 : vector<1x8xf32>
    %c3 = arith.constant 3 : index
    %c0_23 = arith.constant 0 : index
    %213 = vector.load %arg2[%c3, %c0_23] : memref<8x8xf32, #tpu.memory_space<vmem>>, vector<1x8xf32>
    tpu.vector_store %arg2[%c3, %c0_23], %212 {strides = array<i32>} : memref<8x8xf32, #tpu.memory_space<vmem>>, vector<1x8xf32>,
    %214 = vector.extract_strided_slice %212 {offsets = [0, 0], sizes = [1, 1], strides = [1, 1]} : vector<1x8xf32> to vector<1x1xf32>
    %215 = vector.broadcast %214 : vector<1x1xf32> to vector<1x128xf32>
    %216 = arith.mulf %215, %7 : vector<1x128xf32>
    %217 = vector.extract_strided_slice %212 {offsets = [0, 1], sizes = [1, 1], strides = [1, 1]} : vector<1x8xf32> to vector<1x1xf32>
    %218 = vector.broadcast %217 : vector<1x1xf32> to vector<1x128xf32>
    %219 = arith.mulf %218, %8 : vector<1x128xf32>
    %220 = vector.extract_strided_slice %212 {offsets = [0, 2], sizes = [1, 1], strides = [1, 1]} : vector<1x8xf32> to vector<1x1xf32>
    %221 = vector.broadcast %220 : vector<1x1xf32> to vector<1x128xf32>
    %222 = arith.mulf %221, %9 : vector<1x128xf32>
    %223 = vector.extract_strided_slice %212 {offsets = [0, 3], sizes = [1, 1], strides = [1, 1]} : vector<1x8xf32> to vector<1x1xf32>
    %224 = vector.broadcast %223 : vector<1x1xf32> to vector<1x128xf32>
    %225 = arith.mulf %224, %10 : vector<1x128xf32>
    %226 = vector.extract_strided_slice %212 {offsets = [0, 4], sizes = [1, 1], strides = [1, 1]} : vector<1x8xf32> to vector<1x1xf32>
    %227 = vector.broadcast %226 : vector<1x1xf32> to vector<1x128xf32>
    %228 = arith.mulf %227, %11 : vector<1x128xf32>
    %229 = vector.extract_strided_slice %212 {offsets = [0, 5], sizes = [1, 1], strides = [1, 1]} : vector<1x8xf32> to vector<1x1xf32>
    %230 = vector.broadcast %229 : vector<1x1xf32> to vector<1x128xf32>
    %231 = arith.mulf %230, %12 : vector<1x128xf32>
    %232 = vector.extract_strided_slice %212 {offsets = [0, 6], sizes = [1, 1], strides = [1, 1]} : vector<1x8xf32> to vector<1x1xf32>
    %233 = vector.broadcast %232 : vector<1x1xf32> to vector<1x128xf32>
    %234 = arith.mulf %233, %13 : vector<1x128xf32>
    %235 = vector.extract_strided_slice %212 {offsets = [0, 7], sizes = [1, 1], strides = [1, 1]} : vector<1x8xf32> to vector<1x1xf32>
    %236 = vector.broadcast %235 : vector<1x1xf32> to vector<1x128xf32>
    %237 = arith.mulf %236, %14 : vector<1x128xf32>
    %238 = arith.addf %216, %219 : vector<1x128xf32>
    %239 = arith.addf %222, %225 : vector<1x128xf32>
    %240 = arith.addf %228, %231 : vector<1x128xf32>
    %241 = arith.addf %234, %237 : vector<1x128xf32>
    %242 = arith.addf %238, %239 : vector<1x128xf32>
    %243 = arith.addf %240, %241 : vector<1x128xf32>
    %244 = arith.addf %242, %243 : vector<1x128xf32>
    %245 = vector.extract_strided_slice %17 {offsets = [4, 0], sizes = [1, 128], strides = [1, 1]} : vector<8x128xf32> to vector<1x128xf32>
    %246 = arith.addf %245, %244 : vector<1x128xf32>
    %247 = arith.negf %246 : vector<1x128xf32>
    %248 = math.exp %247 : vector<1x128xf32>
    %cst_24 = arith.constant 1.000000e+00 : f32
    %249 = vector.broadcast %cst_24 : f32 to vector<1x128xf32>
    %250 = arith.addf %249, %248 : vector<1x128xf32>
    %251 = arith.divf %249, %250 : vector<1x128xf32>
    %252 = math.tanh %246 : vector<1x128xf32>
    %253 = vector.extract_strided_slice %251 {offsets = [0, 0], sizes = [1, 8], strides = [1, 1]} : vector<1x128xf32> to vector<1x8xf32>
    %254 = vector.extract_strided_slice %251 {offsets = [0, 8], sizes = [1, 8], strides = [1, 1]} : vector<1x128xf32> to vector<1x8xf32>
    %255 = vector.extract_strided_slice %252 {offsets = [0, 16], sizes = [1, 8], strides = [1, 1]} : vector<1x128xf32> to vector<1x8xf32>
    %256 = vector.extract_strided_slice %251 {offsets = [0, 24], sizes = [1, 8], strides = [1, 1]} : vector<1x128xf32> to vector<1x8xf32>
    %257 = arith.mulf %254, %210 : vector<1x8xf32>
    %258 = arith.mulf %253, %255 : vector<1x8xf32>
    %259 = arith.addf %257, %258 : vector<1x8xf32>
    %260 = math.tanh %259 : vector<1x8xf32>
    %261 = arith.mulf %256, %260 : vector<1x8xf32>
    %c4 = arith.constant 4 : index
    %c0_25 = arith.constant 0 : index
    %262 = vector.load %arg2[%c4, %c0_25] : memref<8x8xf32, #tpu.memory_space<vmem>>, vector<1x8xf32>
    tpu.vector_store %arg2[%c4, %c0_25], %261 {strides = array<i32>} : memref<8x8xf32, #tpu.memory_space<vmem>>, vector<1x8xf32>,
    %263 = vector.extract_strided_slice %261 {offsets = [0, 0], sizes = [1, 1], strides = [1, 1]} : vector<1x8xf32> to vector<1x1xf32>
    %264 = vector.broadcast %263 : vector<1x1xf32> to vector<1x128xf32>
    %265 = arith.mulf %264, %7 : vector<1x128xf32>
    %266 = vector.extract_strided_slice %261 {offsets = [0, 1], sizes = [1, 1], strides = [1, 1]} : vector<1x8xf32> to vector<1x1xf32>
    %267 = vector.broadcast %266 : vector<1x1xf32> to vector<1x128xf32>
    %268 = arith.mulf %267, %8 : vector<1x128xf32>
    %269 = vector.extract_strided_slice %261 {offsets = [0, 2], sizes = [1, 1], strides = [1, 1]} : vector<1x8xf32> to vector<1x1xf32>
    %270 = vector.broadcast %269 : vector<1x1xf32> to vector<1x128xf32>
    %271 = arith.mulf %270, %9 : vector<1x128xf32>
    %272 = vector.extract_strided_slice %261 {offsets = [0, 3], sizes = [1, 1], strides = [1, 1]} : vector<1x8xf32> to vector<1x1xf32>
    %273 = vector.broadcast %272 : vector<1x1xf32> to vector<1x128xf32>
    %274 = arith.mulf %273, %10 : vector<1x128xf32>
    %275 = vector.extract_strided_slice %261 {offsets = [0, 4], sizes = [1, 1], strides = [1, 1]} : vector<1x8xf32> to vector<1x1xf32>
    %276 = vector.broadcast %275 : vector<1x1xf32> to vector<1x128xf32>
    %277 = arith.mulf %276, %11 : vector<1x128xf32>
    %278 = vector.extract_strided_slice %261 {offsets = [0, 5], sizes = [1, 1], strides = [1, 1]} : vector<1x8xf32> to vector<1x1xf32>
    %279 = vector.broadcast %278 : vector<1x1xf32> to vector<1x128xf32>
    %280 = arith.mulf %279, %12 : vector<1x128xf32>
    %281 = vector.extract_strided_slice %261 {offsets = [0, 6], sizes = [1, 1], strides = [1, 1]} : vector<1x8xf32> to vector<1x1xf32>
    %282 = vector.broadcast %281 : vector<1x1xf32> to vector<1x128xf32>
    %283 = arith.mulf %282, %13 : vector<1x128xf32>
    %284 = vector.extract_strided_slice %261 {offsets = [0, 7], sizes = [1, 1], strides = [1, 1]} : vector<1x8xf32> to vector<1x1xf32>
    %285 = vector.broadcast %284 : vector<1x1xf32> to vector<1x128xf32>
    %286 = arith.mulf %285, %14 : vector<1x128xf32>
    %287 = arith.addf %265, %268 : vector<1x128xf32>
    %288 = arith.addf %271, %274 : vector<1x128xf32>
    %289 = arith.addf %277, %280 : vector<1x128xf32>
    %290 = arith.addf %283, %286 : vector<1x128xf32>
    %291 = arith.addf %287, %288 : vector<1x128xf32>
    %292 = arith.addf %289, %290 : vector<1x128xf32>
    %293 = arith.addf %291, %292 : vector<1x128xf32>
    %294 = vector.extract_strided_slice %17 {offsets = [5, 0], sizes = [1, 128], strides = [1, 1]} : vector<8x128xf32> to vector<1x128xf32>
    %295 = arith.addf %294, %293 : vector<1x128xf32>
    %296 = arith.negf %295 : vector<1x128xf32>
    %297 = math.exp %296 : vector<1x128xf32>
    %cst_26 = arith.constant 1.000000e+00 : f32
    %298 = vector.broadcast %cst_26 : f32 to vector<1x128xf32>
    %299 = arith.addf %298, %297 : vector<1x128xf32>
    %300 = arith.divf %298, %299 : vector<1x128xf32>
    %301 = math.tanh %295 : vector<1x128xf32>
    %302 = vector.extract_strided_slice %300 {offsets = [0, 0], sizes = [1, 8], strides = [1, 1]} : vector<1x128xf32> to vector<1x8xf32>
    %303 = vector.extract_strided_slice %300 {offsets = [0, 8], sizes = [1, 8], strides = [1, 1]} : vector<1x128xf32> to vector<1x8xf32>
    %304 = vector.extract_strided_slice %301 {offsets = [0, 16], sizes = [1, 8], strides = [1, 1]} : vector<1x128xf32> to vector<1x8xf32>
    %305 = vector.extract_strided_slice %300 {offsets = [0, 24], sizes = [1, 8], strides = [1, 1]} : vector<1x128xf32> to vector<1x8xf32>
    %306 = arith.mulf %303, %259 : vector<1x8xf32>
    %307 = arith.mulf %302, %304 : vector<1x8xf32>
    %308 = arith.addf %306, %307 : vector<1x8xf32>
    %309 = math.tanh %308 : vector<1x8xf32>
    %310 = arith.mulf %305, %309 : vector<1x8xf32>
    %c5 = arith.constant 5 : index
    %c0_27 = arith.constant 0 : index
    %311 = vector.load %arg2[%c5, %c0_27] : memref<8x8xf32, #tpu.memory_space<vmem>>, vector<1x8xf32>
    tpu.vector_store %arg2[%c5, %c0_27], %310 {strides = array<i32>} : memref<8x8xf32, #tpu.memory_space<vmem>>, vector<1x8xf32>,
    %312 = vector.extract_strided_slice %310 {offsets = [0, 0], sizes = [1, 1], strides = [1, 1]} : vector<1x8xf32> to vector<1x1xf32>
    %313 = vector.broadcast %312 : vector<1x1xf32> to vector<1x128xf32>
    %314 = arith.mulf %313, %7 : vector<1x128xf32>
    %315 = vector.extract_strided_slice %310 {offsets = [0, 1], sizes = [1, 1], strides = [1, 1]} : vector<1x8xf32> to vector<1x1xf32>
    %316 = vector.broadcast %315 : vector<1x1xf32> to vector<1x128xf32>
    %317 = arith.mulf %316, %8 : vector<1x128xf32>
    %318 = vector.extract_strided_slice %310 {offsets = [0, 2], sizes = [1, 1], strides = [1, 1]} : vector<1x8xf32> to vector<1x1xf32>
    %319 = vector.broadcast %318 : vector<1x1xf32> to vector<1x128xf32>
    %320 = arith.mulf %319, %9 : vector<1x128xf32>
    %321 = vector.extract_strided_slice %310 {offsets = [0, 3], sizes = [1, 1], strides = [1, 1]} : vector<1x8xf32> to vector<1x1xf32>
    %322 = vector.broadcast %321 : vector<1x1xf32> to vector<1x128xf32>
    %323 = arith.mulf %322, %10 : vector<1x128xf32>
    %324 = vector.extract_strided_slice %310 {offsets = [0, 4], sizes = [1, 1], strides = [1, 1]} : vector<1x8xf32> to vector<1x1xf32>
    %325 = vector.broadcast %324 : vector<1x1xf32> to vector<1x128xf32>
    %326 = arith.mulf %325, %11 : vector<1x128xf32>
    %327 = vector.extract_strided_slice %310 {offsets = [0, 5], sizes = [1, 1], strides = [1, 1]} : vector<1x8xf32> to vector<1x1xf32>
    %328 = vector.broadcast %327 : vector<1x1xf32> to vector<1x128xf32>
    %329 = arith.mulf %328, %12 : vector<1x128xf32>
    %330 = vector.extract_strided_slice %310 {offsets = [0, 6], sizes = [1, 1], strides = [1, 1]} : vector<1x8xf32> to vector<1x1xf32>
    %331 = vector.broadcast %330 : vector<1x1xf32> to vector<1x128xf32>
    %332 = arith.mulf %331, %13 : vector<1x128xf32>
    %333 = vector.extract_strided_slice %310 {offsets = [0, 7], sizes = [1, 1], strides = [1, 1]} : vector<1x8xf32> to vector<1x1xf32>
    %334 = vector.broadcast %333 : vector<1x1xf32> to vector<1x128xf32>
    %335 = arith.mulf %334, %14 : vector<1x128xf32>
    %336 = arith.addf %314, %317 : vector<1x128xf32>
    %337 = arith.addf %320, %323 : vector<1x128xf32>
    %338 = arith.addf %326, %329 : vector<1x128xf32>
    %339 = arith.addf %332, %335 : vector<1x128xf32>
    %340 = arith.addf %336, %337 : vector<1x128xf32>
    %341 = arith.addf %338, %339 : vector<1x128xf32>
    %342 = arith.addf %340, %341 : vector<1x128xf32>
    %343 = vector.extract_strided_slice %17 {offsets = [6, 0], sizes = [1, 128], strides = [1, 1]} : vector<8x128xf32> to vector<1x128xf32>
    %344 = arith.addf %343, %342 : vector<1x128xf32>
    %345 = arith.negf %344 : vector<1x128xf32>
    %346 = math.exp %345 : vector<1x128xf32>
    %cst_28 = arith.constant 1.000000e+00 : f32
    %347 = vector.broadcast %cst_28 : f32 to vector<1x128xf32>
    %348 = arith.addf %347, %346 : vector<1x128xf32>
    %349 = arith.divf %347, %348 : vector<1x128xf32>
    %350 = math.tanh %344 : vector<1x128xf32>
    %351 = vector.extract_strided_slice %349 {offsets = [0, 0], sizes = [1, 8], strides = [1, 1]} : vector<1x128xf32> to vector<1x8xf32>
    %352 = vector.extract_strided_slice %349 {offsets = [0, 8], sizes = [1, 8], strides = [1, 1]} : vector<1x128xf32> to vector<1x8xf32>
    %353 = vector.extract_strided_slice %350 {offsets = [0, 16], sizes = [1, 8], strides = [1, 1]} : vector<1x128xf32> to vector<1x8xf32>
    %354 = vector.extract_strided_slice %349 {offsets = [0, 24], sizes = [1, 8], strides = [1, 1]} : vector<1x128xf32> to vector<1x8xf32>
    %355 = arith.mulf %352, %308 : vector<1x8xf32>
    %356 = arith.mulf %351, %353 : vector<1x8xf32>
    %357 = arith.addf %355, %356 : vector<1x8xf32>
    %358 = math.tanh %357 : vector<1x8xf32>
    %359 = arith.mulf %354, %358 : vector<1x8xf32>
    %c6 = arith.constant 6 : index
    %c0_29 = arith.constant 0 : index
    %360 = vector.load %arg2[%c6, %c0_29] : memref<8x8xf32, #tpu.memory_space<vmem>>, vector<1x8xf32>
    tpu.vector_store %arg2[%c6, %c0_29], %359 {strides = array<i32>} : memref<8x8xf32, #tpu.memory_space<vmem>>, vector<1x8xf32>,
    %361 = vector.extract_strided_slice %359 {offsets = [0, 0], sizes = [1, 1], strides = [1, 1]} : vector<1x8xf32> to vector<1x1xf32>
    %362 = vector.broadcast %361 : vector<1x1xf32> to vector<1x128xf32>
    %363 = arith.mulf %362, %7 : vector<1x128xf32>
    %364 = vector.extract_strided_slice %359 {offsets = [0, 1], sizes = [1, 1], strides = [1, 1]} : vector<1x8xf32> to vector<1x1xf32>
    %365 = vector.broadcast %364 : vector<1x1xf32> to vector<1x128xf32>
    %366 = arith.mulf %365, %8 : vector<1x128xf32>
    %367 = vector.extract_strided_slice %359 {offsets = [0, 2], sizes = [1, 1], strides = [1, 1]} : vector<1x8xf32> to vector<1x1xf32>
    %368 = vector.broadcast %367 : vector<1x1xf32> to vector<1x128xf32>
    %369 = arith.mulf %368, %9 : vector<1x128xf32>
    %370 = vector.extract_strided_slice %359 {offsets = [0, 3], sizes = [1, 1], strides = [1, 1]} : vector<1x8xf32> to vector<1x1xf32>
    %371 = vector.broadcast %370 : vector<1x1xf32> to vector<1x128xf32>
    %372 = arith.mulf %371, %10 : vector<1x128xf32>
    %373 = vector.extract_strided_slice %359 {offsets = [0, 4], sizes = [1, 1], strides = [1, 1]} : vector<1x8xf32> to vector<1x1xf32>
    %374 = vector.broadcast %373 : vector<1x1xf32> to vector<1x128xf32>
    %375 = arith.mulf %374, %11 : vector<1x128xf32>
    %376 = vector.extract_strided_slice %359 {offsets = [0, 5], sizes = [1, 1], strides = [1, 1]} : vector<1x8xf32> to vector<1x1xf32>
    %377 = vector.broadcast %376 : vector<1x1xf32> to vector<1x128xf32>
    %378 = arith.mulf %377, %12 : vector<1x128xf32>
    %379 = vector.extract_strided_slice %359 {offsets = [0, 6], sizes = [1, 1], strides = [1, 1]} : vector<1x8xf32> to vector<1x1xf32>
    %380 = vector.broadcast %379 : vector<1x1xf32> to vector<1x128xf32>
    %381 = arith.mulf %380, %13 : vector<1x128xf32>
    %382 = vector.extract_strided_slice %359 {offsets = [0, 7], sizes = [1, 1], strides = [1, 1]} : vector<1x8xf32> to vector<1x1xf32>
    %383 = vector.broadcast %382 : vector<1x1xf32> to vector<1x128xf32>
    %384 = arith.mulf %383, %14 : vector<1x128xf32>
    %385 = arith.addf %363, %366 : vector<1x128xf32>
    %386 = arith.addf %369, %372 : vector<1x128xf32>
    %387 = arith.addf %375, %378 : vector<1x128xf32>
    %388 = arith.addf %381, %384 : vector<1x128xf32>
    %389 = arith.addf %385, %386 : vector<1x128xf32>
    %390 = arith.addf %387, %388 : vector<1x128xf32>
    %391 = arith.addf %389, %390 : vector<1x128xf32>
    %392 = vector.extract_strided_slice %17 {offsets = [7, 0], sizes = [1, 128], strides = [1, 1]} : vector<8x128xf32> to vector<1x128xf32>
    %393 = arith.addf %392, %391 : vector<1x128xf32>
    %394 = arith.negf %393 : vector<1x128xf32>
    %395 = math.exp %394 : vector<1x128xf32>
    %cst_30 = arith.constant 1.000000e+00 : f32
    %396 = vector.broadcast %cst_30 : f32 to vector<1x128xf32>
    %397 = arith.addf %396, %395 : vector<1x128xf32>
    %398 = arith.divf %396, %397 : vector<1x128xf32>
    %399 = math.tanh %393 : vector<1x128xf32>
    %400 = vector.extract_strided_slice %398 {offsets = [0, 0], sizes = [1, 8], strides = [1, 1]} : vector<1x128xf32> to vector<1x8xf32>
    %401 = vector.extract_strided_slice %398 {offsets = [0, 8], sizes = [1, 8], strides = [1, 1]} : vector<1x128xf32> to vector<1x8xf32>
    %402 = vector.extract_strided_slice %399 {offsets = [0, 16], sizes = [1, 8], strides = [1, 1]} : vector<1x128xf32> to vector<1x8xf32>
    %403 = vector.extract_strided_slice %398 {offsets = [0, 24], sizes = [1, 8], strides = [1, 1]} : vector<1x128xf32> to vector<1x8xf32>
    %404 = arith.mulf %401, %357 : vector<1x8xf32>
    %405 = arith.mulf %400, %402 : vector<1x8xf32>
    %406 = arith.addf %404, %405 : vector<1x8xf32>
    %407 = math.tanh %406 : vector<1x8xf32>
    %408 = arith.mulf %403, %407 : vector<1x8xf32>
    %c7 = arith.constant 7 : index
    %c0_31 = arith.constant 0 : index
    %409 = vector.load %arg2[%c7, %c0_31] : memref<8x8xf32, #tpu.memory_space<vmem>>, vector<1x8xf32>
    tpu.vector_store %arg2[%c7, %c0_31], %408 {strides = array<i32>} : memref<8x8xf32, #tpu.memory_space<vmem>>, vector<1x8xf32>,
    %c0_32 = arith.constant 0 : index
    %c0_33 = arith.constant 0 : index
    %410 = vector.load %arg2[%c0_32, %c0_33] : memref<8x8xf32, #tpu.memory_space<vmem>>, vector<8x8xf32>
    %cst_34 = arith.constant dense<0.000000e+00> : vector<8x128xf32>
    %411 = tpu.matmul %410, %2, %cst_34 {dimension_numbers = #tpu.dot_dimension_numbers<[1], [0], [0], [1], [0, 0, 1, 1], [], []>} : vector<8x8xf32>, vector<8x128xf32>, vector<8x128xf32> -> vector<8x128xf32>
    %412 = vector.broadcast %3 : vector<1x128xf32> to vector<8x128xf32>
    %413 = arith.addf %411, %412 : vector<8x128xf32>
    %414 = arith.negf %413 : vector<8x128xf32>
    %415 = math.exp %414 : vector<8x128xf32>
    %cst_35 = arith.constant 1.000000e+00 : f32
    %416 = vector.broadcast %cst_35 : f32 to vector<8x128xf32>
    %417 = arith.addf %416, %415 : vector<8x128xf32>
    %418 = arith.divf %416, %417 : vector<8x128xf32>
    %cst_36 = arith.constant 2.000000e+00 : f32
    %419 = vector.broadcast %cst_36 : f32 to vector<8x128xf32>
    %420 = arith.mulf %419, %418 : vector<8x128xf32>
    %c0_37 = arith.constant 0 : index
    %c0_38 = arith.constant 0 : index
    %421 = vector.load %arg1[%c0_37, %c0_38] : memref<8x128xf32, #tpu.memory_space<vmem>>, vector<8x128xf32>
    tpu.vector_store %arg1[%c0_37, %c0_38], %420 {strides = array<i32>} : memref<8x128xf32, #tpu.memory_space<vmem>>, vector<8x128xf32>,
    return
  }
}

</mosaic_0001>

<bundles_post_ra>
// kernel: lstm_ad_forward.1
= control target key start
LH: loop header
LB: loop body
LE: loop exit
PB: predicated region body
PF: predicated region fallthrough
CT: control target
= control target key end

     0   :  { %vm28_vm0 = vcmask 64512   ;;  %v1182_v2 = vmov 0.0   ;;  %vm1183_vm1 = vmmov 0   ;;  %v1184_v4 = vmov 2   ;;  %s1550_s0 = inlined_call_operand.vmem [shape: f32[40,128], index: 0, kind: input, shape index: {}]   ;;  %s1551_s1 = inlined_call_operand.hbm [shape: f32[8,128], index: 1, kind: output, shape index: {}]  }
   0x1   :  { %v9_v0 = vld [vmem:[%s1550_s0] sm:$0xff]  ;;  %994 = vmatprep.subr.mxu0 %v1182_v2  ;;  %996 = vmatprep.mubr.msk.f32.mxu0 %vm1183_vm1, %v1182_v2  ;;  %v14_v3 = vld [vmem:[%s1550_s0 + $0x1a] sm:$0x1] }
   0x2   :  { %v13_v1 = vld [vmem:[%s1550_s0 + $0x20] sm:$0xff]  ;;  %995 = vmatpush3.msra.mxu0 %v9_v0  ;;  %1029 = vset.pattern.permute.xlu1 %v1184_v4 }
   0x3   :  { %997 = vmatmul.mubr.msk.f32.vlgmr.msra.gmra.mxu0 %vm28_vm0, %v13_v1  ;;  %114 = vperm.xlu1 %1029, %v14_v3  }
   0x4   :  { %6 = vsyncpa [#allocation4], 0  ;;  %v1185_v5 = vmov 0   ;;  %999 = vmatprep.subr.mxu1 %v1182_v2  ;;  %1001 = vmatprep.mubr.msk.f32.mxu1 %vm1183_vm1, %v1182_v2  ;;  %v1186_v6 = vmov 3   ;;  %v1187_v7 = vmov 1   ;;  %v1188_v8 = vmov 4  }
   0x5   :  { %1027 = vset.pattern.permute.xlu0 %v1185_v5  ;;  %v1189_v9 = vmov 5   ;;  %v1190_v10 = vmov 6   ;;  %v1191_v11 = vmov 7   ;;  %v15_v12 = vld [vmem:[%s1550_s0 + $0x1b] sm:$0x1]  ;;  %s1192_s14 = smov 8  }
   0x6   :  { %104 = vperm.xlu0 %1027, %v14_v3   ;;  %v1232_v19 = vld [vmem:[%s1550_s0 + $0xa] sm:$0x1]  ;;  %v1237_v20 = vld [vmem:[%s1550_s0 + $0xb] sm:$0x1]  ;;  %v1242_v21 = vld [vmem:[%s1550_s0 + $0xc] sm:$0x1] }
   0x7   :  { %1030 = vset.pattern.permute.xlu1 %v1186_v6  ;;  %v1247_v22 = vld [vmem:[%s1550_s0 + $0x8] sm:$0x1]  ;;  %v1252_v23 = vld [vmem:[%s1550_s0 + $0x9] sm:$0x1]  ;;  %v1257_v24 = vld [vmem:[%s1550_s0 + $0xe] sm:$0x1] }
   0x8   :  { %119 = vperm.xlu1 %1030, %v14_v3   ;;  %v1262_v25 = vld [vmem:[%s1550_s0 + $0xf] sm:$0x1]  ;;  %v1267_v27 = vld [vmem:[%s1550_s0 + $0xd] sm:$0x1]  ;;  %v977_v43 = vld [vmem:[%s1550_s0 + $0x18] ss:$0 sm:$0xff] }
   0x9   :  { %s1193_s4 = smov 112   ;;  %v1194_v60 = vmov 25   ;;  %v1195_v61 = vmov 24   ;;  %s1196_s5 = smov 16   ;;  %v1197_v1 = vmov 26   ;;  %v1198_v2 = vmov 27  }
   0xa   :  { %1028 = vset.pattern.permute.xlu0 %v1187_v7  ;;  %v1200_v4 = vmov 30   ;;  %v1201_v5 = vmov 29   ;;  %v1202_v6 = vmov 31   ;;  %s1203_s6 = smov 104   ;;  %vm183_vm2 = vcmask 57344   ;;  %s1204_s11 = smov [#allocation3]  }
   0xb   :  { %109 = vperm.xlu0 %1028, %v14_v3   ;;  %vm375_vm3 = vcmask 59394   ;;  %vm575_vm4 = vcmask 61444   ;;  %vm775_vm5 = vcmask 63494   ;;  %vm267_vm6 = vcmask 58369   ;;  %s969_s12 = sshll.u32 %s1204_s11, 4  ;;  %s970_s12 = int_to_ptr.vmem [resolvable:$true] %s969_s12 }
   0xc   :  { %1031 = vset.pattern.permute.xlu1 %v1188_v8  ;;  %vm475_vm7 = vcmask 60419   ;;  %vm675_vm8 = vcmask 62469   ;;  %vm875_vm9 = vcmask 64519   ;;  %s1160_s13 = scalar_lea.vmem %s970_s12, 128  ;;  %p1165_p1 = scmp.lt.s32.totalorder %s970_s12, %s970_s12 }
   0xd   :  { %124 = vperm.xlu1 %1031, %v14_v3   ;;  %p1161_p0 = scmp.ne.s32.totalorder %s970_s12, %s1160_s13  ;;  %p1166_p2 = scmp.lt.s32.totalorder %s1160_s13, %s1160_s13 }
   0xf   :  { %1032 = vset.pattern.permute.xlu0 %v1189_v9  ;;  %p1167_p3 = por %p1166_p2, %p1165_p1 }
  0x10   :  { %129 = vperm.xlu0 %1032, %v14_v3  }
  0x11   :  { %1033 = vset.pattern.permute.xlu1 %v1190_v10  ;;  %p1168_p4 = pnand %p1167_p3, %p1161_p0 }
  0x12   :  { %134 = vperm.xlu1 %1033, %v14_v3  }
  0x14   :  { %1035 = vset.pattern.permute.xlu0 %v1195_v61 }
  0x16   :  { %1034 = vset.pattern.permute.xlu1 %v1191_v11 }
  0x17   :  { %139 = vperm.xlu1 %1034, %v14_v3   ;;  %v1199_v3 = vmov 28  }
  0x1b   :  { %159 = vrot.lane.b32.xlu1 %v15_v12, %s1192_s14 }
  0x1c   :  { %1036 = vset.pattern.permute.xlu1 %v1194_v60 }
  0x7e   :  { %v115_v13 = vpop.permute.xlu1 %114 }
  0x7f   :  { %v117_v29 = vmul.f32 %v115_v13, %v1232_v19 }
  0x81   :  { %v105_v16 = vpop.permute.xlu0 %104 }
  0x82   :  { %v107_v31 = vmul.f32 %v105_v16, %v1247_v22 }
  0x83   :  { %v120_v14 = vpop.permute.xlu1 %119 }
  0x84   :  { %v122_v30 = vmul.f32 %v120_v14, %v1237_v20 }
  0x86   :  { %v110_v18 = vpop.permute.xlu0 %109  ;;  %v144_v37 = vadd.f32 %v122_v30, %v117_v29 }
  0x87   :  { %v112_v32 = vmul.f32 %v110_v18, %v1252_v23 }
  0x88   :  { %v125_v15 = vpop.permute.xlu1 %124 }
  0x89   :  { %v127_v33 = vmul.f32 %v125_v15, %v1242_v21  ;;  %v143_v38 = vadd.f32 %v112_v32, %v107_v31 }
  0x8b   :  { %v130_v28 = vpop.permute.xlu0 %129  ;;  %v147_v41 = vadd.f32 %v144_v37, %v143_v38 }
  0x8c   :  { %v132_v36 = vmul.f32 %v130_v28, %v1267_v27 }
  0x8d   :  { %v135_v17 = vpop.permute.xlu1 %134 }
  0x8e   :  { %v137_v34 = vmul.f32 %v135_v17, %v1257_v24  ;;  %v145_v40 = vadd.f32 %v132_v36, %v127_v33 }
  0x92   :  { %v140_v26 = vpop.permute.xlu1 %139 }
  0x93   :  { %v142_v35 = vmul.f32 %v140_v26, %v1262_v25 }
  0x95   :  { %v146_v39 = vadd.f32 %v142_v35, %v137_v34 }
  0x96   :  { %v160_v56 = vpop.permute.xlu1 %159 }
  0x97   :  { %v148_v42 = vadd.f32 %v146_v39, %v145_v40 }
  0x99   :  { %v149_v45 = vadd.f32 %v148_v42, %v147_v41 }
  0xc3   :  { %v98_v44 = vpop.f32.mrf.mxu0 }
  0xc4   :  { %v1280_v46 = vadd.f32 %v977_v43, %v98_v44 }
  0xc5   :  { %v998_v47 = vpop.f32.mrf.mxu0 }
  0xc6   :  { %v150_v48 = vadd.f32 %v149_v45, %v1280_v46 }
  0xc8   :  { %1092 = vtanh.f32 %v150_v48  ;;  %v979_v50 = vmul.f32 -1.442695, %v150_v48 }
  0xca   :  { %1094 = vpow2.f32 %v979_v50 }
  0xd5   :  { %v1093_v49 = vpop.eup %1092 }
  0xd6   :  { %164 = vrot.lane.b32.xlu0 %v1093_v49, %s1193_s4 }
  0xd7   :  { %v1095_v51 = vpop.eup %1094 }
  0xd8   :  { %v154_v52 = vadd.f32 1.0, %v1095_v51 }
  0xda   :  { %1096 = vrcp.f32 %v154_v52 }
  0xe7   :  { %v1097_v53 = vpop.eup %1096 }
  0xe8   :  { %v162_v57 = vmul.f32 %v1097_v53, %v160_v56 }
 0x148   :  { %v165_v54 = vpop.permute.xlu0 %164 }
 0x149   :  { %v167_v55 = vmul.f32 %v1097_v53, %v165_v54 }
 0x14b   :  { %169 = vrot.lane.b32.xlu0 %v167_v55, %s1192_s14 }
 0x1bd   :  { %v170_v58 = vpop.permute.xlu0 %169 }
 0x1be   :  { %v1285_v59 = vadd.f32 %v170_v58, %v162_v57 }
 0x1c0   :  { %1098 = vtanh.f32 %v1285_v59  ;;  %v244_v48 = vrot.slane %v1285_v59, 7 }
 0x1cd   :  { %v1099_v62 = vpop.eup %1098 }
 0x1ce   :  { %175 = vrot.lane.b32.xlu1 %v1099_v62, %s1196_s5  ;;  %v290_v62 = vrot.slane %v1232_v19, 7 }
 0x240   :  { %v176_v63 = vpop.permute.xlu1 %175 }
 0x241   :  { %v1291_v0 = vmul.f32 %v1097_v53, %v176_v63  ;;  %v298_v63 = vrot.slane %v1237_v20, 7 }
 0x243   :  { %191 = vperm.xlu1 %1036, %v1291_v0   ;;  %186 = vperm.xlu0 %1035, %v1291_v0  }
 0x247   :  { %1037 = vset.pattern.permute.xlu1 %v1197_v1  ;;  %1038 = vset.pattern.permute.xlu0 %v1198_v2 }
 0x248   :  { %196 = vperm.xlu1 %1037, %v1291_v0   ;;  %201 = vperm.xlu0 %1038, %v1291_v0  }
 0x24c   :  { %1039 = vset.pattern.permute.xlu1 %v1199_v3  ;;  %1041 = vset.pattern.permute.xlu0 %v1200_v4 }
 0x24d   :  { %206 = vperm.xlu1 %1039, %v1291_v0   ;;  %216 = vperm.xlu0 %1041, %v1291_v0  }
 0x251   :  { %1040 = vset.pattern.permute.xlu1 %v1201_v5  ;;  %1043 = vset.pattern.permute.xlu0 %v1195_v61 }
 0x252   :  { %211 = vperm.xlu1 %1040, %v1291_v0  }
 0x256   :  { %1042 = vset.pattern.permute.xlu1 %v1202_v6 }
 0x257   :  { %221 = vperm.xlu1 %1042, %v1291_v0  }
 0x25b   :  { %1044 = vset.pattern.permute.xlu1 %v1194_v60 }
 0x2be   :  { %v192_v7 = vpop.permute.xlu1 %191  ;;  %v187_v9 = vpop.permute.xlu0 %186 }
 0x2bf   :  { %v194_v16 = vmul.f32 %v192_v7, %v1252_v23  ;;  %v189_v17 = vmul.f32 %v187_v9, %v1247_v22  ;;  %v282_v7 = vrot.slane %v1252_v23, 7  ;;  %v314_v9 = vrot.slane %v1267_v27, 7 }
 0x2c1   :  { %v225_v32 = vadd.f32 %v194_v16, %v189_v17 }
 0x2c3   :  { %v197_v8 = vpop.permute.xlu1 %196  ;;  %v202_v11 = vpop.permute.xlu0 %201 }
 0x2c4   :  { %v199_v13 = vmul.f32 %v197_v8, %v1232_v19  ;;  %v204_v14 = vmul.f32 %v202_v11, %v1237_v20  ;;  %v274_v8 = vrot.slane %v1247_v22, 7  ;;  %v306_v11 = vrot.slane %v1242_v21, 7 }
 0x2c6   :  { %v226_v28 = vadd.f32 %v204_v14, %v199_v13  ;;  %v322_v14 = vrot.slane %v1257_v24, 7 }
 0x2c8   :  { %v207_v10 = vpop.permute.xlu1 %206  ;;  %v217_v15 = vpop.permute.xlu0 %216  ;;  %v229_v35 = vadd.f32 %v226_v28, %v225_v32 }
 0x2c9   :  { %v209_v29 = vmul.f32 %v207_v10, %v1242_v21  ;;  %v219_v30 = vmul.f32 %v217_v15, %v1257_v24  ;;  %v330_v15 = vrot.slane %v1262_v25, 7 }
 0x2cd   :  { %v212_v12 = vpop.permute.xlu1 %211 }
 0x2ce   :  { %v214_v18 = vmul.f32 %v212_v12, %v1267_v27 }
 0x2d0   :  { %v227_v33 = vadd.f32 %v214_v18, %v209_v29 }
 0x2d2   :  { %v222_v26 = vpop.permute.xlu1 %221 }
 0x2d3   :  { %v224_v31 = vmul.f32 %v222_v26, %v1262_v25 }
 0x2d5   :  { %v228_v34 = vadd.f32 %v224_v31, %v219_v30 }
 0x2d7   :  { %v230_v36 = vadd.f32 %v228_v34, %v227_v33 }
 0x2d9   :  { %v231_v37 = vadd.f32 %v230_v36, %v229_v35 }
 0x2db   :  { %v233_v38 = vrot.slane %v231_v37, 7 }
 0x2dd   :  { %v235_v39 = vadd.f32 %v233_v38, %v1280_v46 }
 0x2df   :  { %1100 = vtanh.f32 %v235_v39  ;;  %v980_v41 = vmul.f32 -1.442695, %v235_v39 }
 0x2e1   :  { %1102 = vpow2.f32 %v980_v41 }
 0x2ec   :  { %v1101_v40 = vpop.eup %1100 }
 0x2ed   :  { %248 = vrot.lane.b32.xlu1 %v1101_v40, %s1193_s4 }
 0x2ee   :  { %v1103_v42 = vpop.eup %1102 }
 0x2ef   :  { %v239_v43 = vadd.f32 1.0, %v1103_v42 }
 0x2f1   :  { %1104 = vrcp.f32 %v239_v43 }
 0x2fe   :  { %v1105_v44 = vpop.eup %1104 }
 0x2ff   :  { %v246_v49 = vmul.f32 %v1105_v44, %v244_v48 }
 0x35f   :  { %v249_v45 = vpop.permute.xlu1 %248 }
 0x360   :  { %v251_v47 = vmul.f32 %v1105_v44, %v249_v45 }
 0x362   :  { %253 = vrot.lane.b32.xlu0 %v251_v47, %s1192_s14 }
 0x3d4   :  { %v254_v50 = vpop.permute.xlu0 %253 }
 0x3d5   :  { %v1321_v51 = vadd.f32 %v254_v50, %v246_v49 }
 0x3d7   :  { %1106 = vtanh.f32 %v1321_v51  ;;  %v352_v49 = vrot.slane %v1321_v51, 7 }
 0x3e4   :  { %v1107_v52 = vpop.eup %1106 }
 0x3e5   :  { %259 = vrot.lane.b32.xlu1 %v1107_v52, %s1196_s5 }
 0x457   :  { %v260_v53 = vpop.permute.xlu1 %259 }
 0x458   :  { %v1325_v54 = vmul.f32 %v1105_v44, %v260_v53 }
 0x45a   :  { %278 = vperm.xlu1 %1044, %v1325_v54   ;;  %270 = vperm.xlu0 %1043, %v1325_v54  }
 0x45e   :  { %1045 = vset.pattern.permute.xlu1 %v1197_v1  ;;  %1046 = vset.pattern.permute.xlu0 %v1198_v2 }
 0x45f   :  { %286 = vperm.xlu1 %1045, %v1325_v54   ;;  %294 = vperm.xlu0 %1046, %v1325_v54  }
 0x463   :  { %1047 = vset.pattern.permute.xlu1 %v1199_v3  ;;  %1049 = vset.pattern.permute.xlu0 %v1200_v4 }
 0x464   :  { %302 = vperm.xlu1 %1047, %v1325_v54   ;;  %318 = vperm.xlu0 %1049, %v1325_v54  }
 0x468   :  { %1048 = vset.pattern.permute.xlu1 %v1201_v5  ;;  %1051 = vset.pattern.permute.xlu0 %v1195_v61 }
 0x469   :  { %310 = vperm.xlu1 %1048, %v1325_v54  }
 0x46d   :  { %1050 = vset.pattern.permute.xlu1 %v1202_v6 }
 0x46e   :  { %326 = vperm.xlu1 %1050, %v1325_v54  }
 0x472   :  { %1052 = vset.pattern.permute.xlu1 %v1194_v60 }
 0x4d5   :  { %v279_v55 = vpop.permute.xlu1 %278  ;;  %v271_v57 = vpop.permute.xlu0 %270 }
 0x4d6   :  { %v284_v17 = vmul.f32 %v282_v7, %v279_v55  ;;  %v276_v18 = vmul.f32 %v274_v8, %v271_v57  ;;  %v395_v7 = vrot.slane %v1232_v19, 6  ;;  %v402_v8 = vrot.slane %v1237_v20, 6 }
 0x4d8   :  { %v333_v33 = vadd.f32 %v284_v17, %v276_v18  ;;  %v430_v17 = vrot.slane %v1262_v25, 6 }
 0x4da   :  { %v287_v56 = vpop.permute.xlu1 %286  ;;  %v295_v59 = vpop.permute.xlu0 %294 }
 0x4db   :  { %v292_v12 = vmul.f32 %v290_v62, %v287_v56  ;;  %v300_v13 = vmul.f32 %v298_v63, %v295_v59 }
 0x4dd   :  { %v334_v29 = vadd.f32 %v300_v13, %v292_v12  ;;  %v409_v13 = vrot.slane %v1242_v21, 6 }
 0x4df   :  { %v303_v58 = vpop.permute.xlu1 %302  ;;  %v319_v16 = vpop.permute.xlu0 %318  ;;  %v337_v36 = vadd.f32 %v334_v29, %v333_v33 }
 0x4e0   :  { %v308_v30 = vmul.f32 %v306_v11, %v303_v58  ;;  %v324_v31 = vmul.f32 %v322_v14, %v319_v16  ;;  %v416_v11 = vrot.slane %v1267_v27, 6  ;;  %v423_v16 = vrot.slane %v1257_v24, 6 }
 0x4e4   :  { %v311_v10 = vpop.permute.xlu1 %310 }
 0x4e5   :  { %v316_v26 = vmul.f32 %v314_v9, %v311_v10  ;;  %v388_v9 = vrot.slane %v1252_v23, 6  ;;  %v381_v10 = vrot.slane %v1247_v22, 6 }
 0x4e7   :  { %v335_v34 = vadd.f32 %v316_v26, %v308_v30 }
 0x4e9   :  { %v327_v28 = vpop.permute.xlu1 %326 }
 0x4ea   :  { %v332_v32 = vmul.f32 %v330_v15, %v327_v28 }
 0x4ec   :  { %v336_v35 = vadd.f32 %v332_v32, %v324_v31 }
 0x4ee   :  { %v338_v37 = vadd.f32 %v336_v35, %v335_v34 }
 0x4f0   :  { %v339_v38 = vadd.f32 %v338_v37, %v337_v36 }
 0x4f2   :  { %v341_v39 = vrot.slane %v339_v38, 7 }
 0x4f4   :  { %v343_v40 = vadd.f32 %v341_v39, %v1280_v46 }
 0x4f6   :  { %1108 = vtanh.f32 %v343_v40  ;;  %v981_v42 = vmul.f32 -1.442695, %v343_v40 }
 0x4f8   :  { %1110 = vpow2.f32 %v981_v42 }
 0x503   :  { %v1109_v41 = vpop.eup %1108 }
 0x504   :  { %356 = vrot.lane.b32.xlu1 %v1109_v41, %s1193_s4 }
 0x505   :  { %v1111_v43 = vpop.eup %1110 }
 0x506   :  { %v347_v44 = vadd.f32 1.0, %v1111_v43 }
 0x508   :  { %1112 = vrcp.f32 %v347_v44 }
 0x515   :  { %v1113_v45 = vpop.eup %1112 }
 0x516   :  { %v354_v50 = vmul.f32 %v1113_v45, %v352_v49 }
 0x576   :  { %v357_v47 = vpop.permute.xlu1 %356 }
 0x577   :  { %v359_v48 = vmul.f32 %v1113_v45, %v357_v47 }
 0x579   :  { %361 = vrot.lane.b32.xlu0 %v359_v48, %s1192_s14 }
 0x5eb   :  { %v362_v52 = vpop.permute.xlu0 %361 }
 0x5ec   :  { %v1355_v53 = vadd.f32 %v362_v52, %v354_v50 }
 0x5ee   :  { %1114 = vtanh.f32 %v1355_v53  ;;  %v452_v52 = vrot.slane %v1355_v53, 7 }
 0x5fb   :  { %v1115_v55 = vpop.eup %1114 }
 0x5fc   :  { %367 = vrot.lane.b32.xlu1 %v1115_v55, %s1196_s5 }
 0x66e   :  { %v368_v56 = vpop.permute.xlu1 %367 }
 0x66f   :  { %v1359_v57 = vmul.f32 %v1113_v45, %v368_v56 }
 0x671   :  { %385 = vperm.xlu1 %1052, %v1359_v57   ;;  %378 = vperm.xlu0 %1051, %v1359_v57  }
 0x675   :  { %1053 = vset.pattern.permute.xlu1 %v1197_v1  ;;  %1054 = vset.pattern.permute.xlu0 %v1198_v2 }
 0x676   :  { %392 = vperm.xlu1 %1053, %v1359_v57   ;;  %399 = vperm.xlu0 %1054, %v1359_v57  }
 0x67a   :  { %1055 = vset.pattern.permute.xlu1 %v1199_v3  ;;  %1057 = vset.pattern.permute.xlu0 %v1200_v4 }
 0x67b   :  { %406 = vperm.xlu1 %1055, %v1359_v57   ;;  %420 = vperm.xlu0 %1057, %v1359_v57  }
 0x67f   :  { %1056 = vset.pattern.permute.xlu1 %v1201_v5  ;;  %1059 = vset.pattern.permute.xlu0 %v1195_v61 }
 0x680   :  { %413 = vperm.xlu1 %1056, %v1359_v57  }
 0x684   :  { %1058 = vset.pattern.permute.xlu1 %v1202_v6 }
 0x685   :  { %427 = vperm.xlu1 %1058, %v1359_v57  }
 0x689   :  { %1060 = vset.pattern.permute.xlu1 %v1194_v60 }
 0x6ec   :  { %v386_v51 = vpop.permute.xlu1 %385  ;;  %v379_v59 = vpop.permute.xlu0 %378 }
 0x6ed   :  { %v390_v26 = vmul.f32 %v388_v9, %v386_v51  ;;  %v383_v28 = vmul.f32 %v381_v10, %v379_v59  ;;  %v495_v10 = vrot.slane %v1232_v19, 5 }
 0x6ef   :  { %v433_v35 = vadd.f32 %v390_v26, %v383_v28  ;;  %v523_v26 = vrot.slane %v1257_v24, 5  ;;  %v530_v28 = vrot.slane %v1262_v25, 5 }
 0x6f1   :  { %v393_v58 = vpop.permute.xlu1 %392  ;;  %v400_v63 = vpop.permute.xlu0 %399 }
 0x6f2   :  { %v397_v14 = vmul.f32 %v395_v7, %v393_v58  ;;  %v404_v15 = vmul.f32 %v402_v8, %v400_v63 }
 0x6f4   :  { %v434_v31 = vadd.f32 %v404_v15, %v397_v14  ;;  %v516_v14 = vrot.slane %v1267_v27, 5 }
 0x6f6   :  { %v407_v62 = vpop.permute.xlu1 %406  ;;  %v421_v18 = vpop.permute.xlu0 %420  ;;  %v437_v38 = vadd.f32 %v434_v31, %v433_v35 }
 0x6f7   :  { %v411_v32 = vmul.f32 %v409_v13, %v407_v62  ;;  %v425_v33 = vmul.f32 %v423_v16, %v421_v18  ;;  %v481_v13 = vrot.slane %v1247_v22, 5  ;;  %v509_v16 = vrot.slane %v1242_v21, 5 }
 0x6fb   :  { %v414_v12 = vpop.permute.xlu1 %413 }
 0x6fc   :  { %v418_v29 = vmul.f32 %v416_v11, %v414_v12  ;;  %v502_v11 = vrot.slane %v1237_v20, 5  ;;  %v488_v12 = vrot.slane %v1252_v23, 5 }
 0x6fe   :  { %v435_v36 = vadd.f32 %v418_v29, %v411_v32 }
 0x700   :  { %v428_v30 = vpop.permute.xlu1 %427 }
 0x701   :  { %v432_v34 = vmul.f32 %v430_v17, %v428_v30 }
 0x703   :  { %v436_v37 = vadd.f32 %v432_v34, %v425_v33 }
 0x705   :  { %v438_v39 = vadd.f32 %v436_v37, %v435_v36 }
 0x707   :  { %v439_v40 = vadd.f32 %v438_v39, %v437_v38 }
 0x709   :  { %v441_v41 = vrot.slane %v439_v40, 7 }
 0x70b   :  { %v443_v42 = vadd.f32 %v441_v41, %v1280_v46 }
 0x70d   :  { %1116 = vtanh.f32 %v443_v42  ;;  %v982_v44 = vmul.f32 -1.442695, %v443_v42 }
 0x70f   :  { %1118 = vpow2.f32 %v982_v44 }
 0x71a   :  { %v1117_v43 = vpop.eup %1116 }
 0x71b   :  { %456 = vrot.lane.b32.xlu1 %v1117_v43, %s1193_s4 }
 0x71c   :  { %v1119_v45 = vpop.eup %1118 }
 0x71d   :  { %v447_v47 = vadd.f32 1.0, %v1119_v45 }
 0x71f   :  { %1120 = vrcp.f32 %v447_v47 }
 0x72c   :  { %v1121_v48 = vpop.eup %1120 }
 0x72d   :  { %v454_v55 = vmul.f32 %v1121_v48, %v452_v52 }
 0x78d   :  { %v457_v49 = vpop.permute.xlu1 %456 }
 0x78e   :  { %v459_v50 = vmul.f32 %v1121_v48, %v457_v49 }
 0x790   :  { %461 = vrot.lane.b32.xlu0 %v459_v50, %s1192_s14 }
 0x802   :  { %v462_v56 = vpop.permute.xlu0 %461 }
 0x803   :  { %v1389_v51 = vadd.f32 %v462_v56, %v454_v55 }
 0x805   :  { %1122 = vtanh.f32 %v1389_v51 }
 0x812   :  { %v1123_v58 = vpop.eup %1122 }
 0x813   :  { %467 = vrot.lane.b32.xlu1 %v1123_v58, %s1196_s5  ;;  %v552_v58 = vrot.slane %v1389_v51, 7 }
 0x885   :  { %v468_v59 = vpop.permute.xlu1 %467 }
 0x886   :  { %v1393_v62 = vmul.f32 %v1121_v48, %v468_v59 }
 0x888   :  { %485 = vperm.xlu1 %1060, %v1393_v62   ;;  %478 = vperm.xlu0 %1059, %v1393_v62  }
 0x88c   :  { %1061 = vset.pattern.permute.xlu1 %v1197_v1  ;;  %1062 = vset.pattern.permute.xlu0 %v1198_v2 }
 0x88d   :  { %492 = vperm.xlu1 %1061, %v1393_v62   ;;  %499 = vperm.xlu0 %1062, %v1393_v62  }
 0x891   :  { %1063 = vset.pattern.permute.xlu1 %v1199_v3  ;;  %1065 = vset.pattern.permute.xlu0 %v1200_v4 }
 0x892   :  { %506 = vperm.xlu1 %1063, %v1393_v62   ;;  %520 = vperm.xlu0 %1065, %v1393_v62  }
 0x896   :  { %1064 = vset.pattern.permute.xlu1 %v1201_v5  ;;  %1067 = vset.pattern.permute.xlu0 %v1195_v61 }
 0x897   :  { %513 = vperm.xlu1 %1064, %v1393_v62  }
 0x89b   :  { %1066 = vset.pattern.permute.xlu1 %v1202_v6 }
 0x89c   :  { %527 = vperm.xlu1 %1066, %v1393_v62  }
 0x8a0   :  { %1068 = vset.pattern.permute.xlu1 %v1194_v60 }
 0x903   :  { %v486_v53 = vpop.permute.xlu1 %485  ;;  %v479_v7 = vpop.permute.xlu0 %478 }
 0x904   :  { %v490_v30 = vmul.f32 %v488_v12, %v486_v53  ;;  %v483_v31 = vmul.f32 %v481_v13, %v479_v7 }
 0x906   :  { %v533_v38 = vadd.f32 %v490_v30, %v483_v31  ;;  %v623_v31 = vrot.slane %v1257_v24, 4 }
 0x908   :  { %v493_v63 = vpop.permute.xlu1 %492  ;;  %v500_v9 = vpop.permute.xlu0 %499 }
 0x909   :  { %v497_v17 = vmul.f32 %v495_v10, %v493_v63  ;;  %v504_v18 = vmul.f32 %v502_v11, %v500_v9 }
 0x90b   :  { %v534_v34 = vadd.f32 %v504_v18, %v497_v17  ;;  %v581_v17 = vrot.slane %v1247_v22, 4  ;;  %v616_v18 = vrot.slane %v1267_v27, 4 }
 0x90d   :  { %v507_v8 = vpop.permute.xlu1 %506  ;;  %v521_v29 = vpop.permute.xlu0 %520  ;;  %v537_v41 = vadd.f32 %v534_v34, %v533_v38 }
 0x90e   :  { %v511_v35 = vmul.f32 %v509_v16, %v507_v8  ;;  %v525_v36 = vmul.f32 %v523_v26, %v521_v29  ;;  %v588_v16 = vrot.slane %v1252_v23, 4 }
 0x912   :  { %v514_v15 = vpop.permute.xlu1 %513 }
 0x913   :  { %v518_v32 = vmul.f32 %v516_v14, %v514_v15  ;;  %v595_v14 = vrot.slane %v1232_v19, 4  ;;  %v602_v15 = vrot.slane %v1237_v20, 4 }
 0x915   :  { %v535_v39 = vadd.f32 %v518_v32, %v511_v35  ;;  %v630_v32 = vrot.slane %v1262_v25, 4 }
 0x917   :  { %v528_v33 = vpop.permute.xlu1 %527 }
 0x918   :  { %v532_v37 = vmul.f32 %v530_v28, %v528_v33  ;;  %v609_v28 = vrot.slane %v1242_v21, 4 }
 0x91a   :  { %v536_v40 = vadd.f32 %v532_v37, %v525_v36 }
 0x91c   :  { %v538_v42 = vadd.f32 %v536_v40, %v535_v39 }
 0x91e   :  { %v539_v43 = vadd.f32 %v538_v42, %v537_v41 }
 0x920   :  { %v541_v44 = vrot.slane %v539_v43, 7 }
 0x922   :  { %v543_v45 = vadd.f32 %v541_v44, %v1280_v46 }
 0x924   :  { %1124 = vtanh.f32 %v543_v45  ;;  %v983_v48 = vmul.f32 -1.442695, %v543_v45 }
 0x926   :  { %1126 = vpow2.f32 %v983_v48 }
 0x931   :  { %v1125_v47 = vpop.eup %1124 }
 0x932   :  { %556 = vrot.lane.b32.xlu1 %v1125_v47, %s1193_s4 }
 0x933   :  { %v1127_v49 = vpop.eup %1126 }
 0x934   :  { %v547_v50 = vadd.f32 1.0, %v1127_v49 }
 0x936   :  { %1128 = vrcp.f32 %v547_v50 }
 0x943   :  { %v1129_v52 = vpop.eup %1128 }
 0x944   :  { %v554_v59 = vmul.f32 %v1129_v52, %v552_v58 }
 0x9a4   :  { %v557_v55 = vpop.permute.xlu1 %556 }
 0x9a5   :  { %v559_v56 = vmul.f32 %v1129_v52, %v557_v55 }
 0x9a7   :  { %561 = vrot.lane.b32.xlu0 %v559_v56, %s1192_s14 }
 0xa19   :  { %v562_v53 = vpop.permute.xlu0 %561 }
 0xa1a   :  { %v1423_v63 = vadd.f32 %v562_v53, %v554_v59 }
 0xa1c   :  { %1130 = vtanh.f32 %v1423_v63 }
 0xa29   :  { %v1131_v7 = vpop.eup %1130 }
 0xa2a   :  { %567 = vrot.lane.b32.xlu1 %v1131_v7, %s1196_s5 }
 0xa9c   :  { %v568_v8 = vpop.permute.xlu1 %567 }
 0xa9d   :  { %v1427_v9 = vmul.f32 %v1129_v52, %v568_v8  ;;  %v652_v8 = vrot.slane %v1423_v63, 7 }
 0xa9f   :  { %585 = vperm.xlu1 %1068, %v1427_v9   ;;  %578 = vperm.xlu0 %1067, %v1427_v9  }
 0xaa3   :  { %1069 = vset.pattern.permute.xlu1 %v1197_v1  ;;  %1070 = vset.pattern.permute.xlu0 %v1198_v2 }
 0xaa4   :  { %592 = vperm.xlu1 %1069, %v1427_v9   ;;  %599 = vperm.xlu0 %1070, %v1427_v9  }
 0xaa8   :  { %1071 = vset.pattern.permute.xlu1 %v1199_v3  ;;  %1073 = vset.pattern.permute.xlu0 %v1200_v4 }
 0xaa9   :  { %606 = vperm.xlu1 %1071, %v1427_v9   ;;  %620 = vperm.xlu0 %1073, %v1427_v9  }
 0xaad   :  { %1072 = vset.pattern.permute.xlu1 %v1201_v5  ;;  %1075 = vset.pattern.permute.xlu0 %v1195_v61 }
 0xaae   :  { %613 = vperm.xlu1 %1072, %v1427_v9  }
 0xab2   :  { %1074 = vset.pattern.permute.xlu1 %v1202_v6 }
 0xab3   :  { %627 = vperm.xlu1 %1074, %v1427_v9  }
 0xab7   :  { %1076 = vset.pattern.permute.xlu1 %v1194_v60 }
 0xb1a   :  { %v586_v51 = vpop.permute.xlu1 %585  ;;  %v579_v11 = vpop.permute.xlu0 %578 }
 0xb1b   :  { %v590_v34 = vmul.f32 %v588_v16, %v586_v51  ;;  %v583_v35 = vmul.f32 %v581_v17, %v579_v11 }
 0xb1d   :  { %v633_v42 = vadd.f32 %v590_v34, %v583_v35  ;;  %v723_v34 = vrot.slane %v1257_v24, 3  ;;  %v730_v35 = vrot.slane %v1262_v25, 3 }
 0xb1f   :  { %v593_v10 = vpop.permute.xlu1 %592  ;;  %v600_v13 = vpop.permute.xlu0 %599 }
 0xb20   :  { %v597_v29 = vmul.f32 %v595_v14, %v593_v10  ;;  %v604_v30 = vmul.f32 %v602_v15, %v600_v13 }
 0xb22   :  { %v634_v38 = vadd.f32 %v604_v30, %v597_v29  ;;  %v688_v29 = vrot.slane %v1252_v23, 3  ;;  %v716_v30 = vrot.slane %v1267_v27, 3 }
 0xb24   :  { %v607_v12 = vpop.permute.xlu1 %606  ;;  %v621_v33 = vpop.permute.xlu0 %620  ;;  %v637_v45 = vadd.f32 %v634_v38, %v633_v42 }
 0xb25   :  { %v611_v39 = vmul.f32 %v609_v28, %v607_v12  ;;  %v625_v40 = vmul.f32 %v623_v31, %v621_v33  ;;  %v702_v28 = vrot.slane %v1237_v20, 3 }
 0xb29   :  { %v614_v26 = vpop.permute.xlu1 %613 }
 0xb2a   :  { %v618_v36 = vmul.f32 %v616_v18, %v614_v26  ;;  %v695_v26 = vrot.slane %v1232_v19, 3 }
 0xb2c   :  { %v635_v43 = vadd.f32 %v618_v36, %v611_v39 }
 0xb2e   :  { %v628_v37 = vpop.permute.xlu1 %627 }
 0xb2f   :  { %v632_v41 = vmul.f32 %v630_v32, %v628_v37  ;;  %v709_v32 = vrot.slane %v1242_v21, 3 }
 0xb31   :  { %v636_v44 = vadd.f32 %v632_v41, %v625_v40 }
 0xb33   :  { %v638_v47 = vadd.f32 %v636_v44, %v635_v43 }
 0xb35   :  { %v639_v48 = vadd.f32 %v638_v47, %v637_v45 }
 0xb37   :  { %v641_v49 = vrot.slane %v639_v48, 7 }
 0xb39   :  { %v643_v50 = vadd.f32 %v641_v49, %v1280_v46 }
 0xb3b   :  { %1132 = vtanh.f32 %v643_v50  ;;  %v984_v55 = vmul.f32 -1.442695, %v643_v50 }
 0xb3d   :  { %1134 = vpow2.f32 %v984_v55 }
 0xb48   :  { %v1133_v52 = vpop.eup %1132 }
 0xb49   :  { %656 = vrot.lane.b32.xlu1 %v1133_v52, %s1193_s4 }
 0xb4a   :  { %v1135_v56 = vpop.eup %1134 }
 0xb4b   :  { %v647_v58 = vadd.f32 1.0, %v1135_v56 }
 0xb4d   :  { %1136 = vrcp.f32 %v647_v58 }
 0xb5a   :  { %v1137_v59 = vpop.eup %1136 }
 0xb5b   :  { %v654_v51 = vmul.f32 %v1137_v59, %v652_v8 }
 0xbbb   :  { %v657_v53 = vpop.permute.xlu1 %656 }
 0xbbc   :  { %v659_v7 = vmul.f32 %v1137_v59, %v657_v53 }
 0xbbe   :  { %661 = vrot.lane.b32.xlu0 %v659_v7, %s1192_s14 }
 0xc30   :  { %v662_v10 = vpop.permute.xlu0 %661 }
 0xc31   :  { %v1457_v11 = vadd.f32 %v662_v10, %v654_v51 }
 0xc33   :  { %1138 = vtanh.f32 %v1457_v11 }
 0xc40   :  { %v1139_v12 = vpop.eup %1138 }
 0xc41   :  { %667 = vrot.lane.b32.xlu1 %v1139_v12, %s1196_s5  ;;  %v752_v12 = vrot.slane %v1457_v11, 7 }
 0xcb3   :  { %v668_v13 = vpop.permute.xlu1 %667 }
 0xcb4   :  { %v1461_v14 = vmul.f32 %v1137_v59, %v668_v13 }
 0xcb6   :  { %685 = vperm.xlu1 %1076, %v1461_v14   ;;  %678 = vperm.xlu0 %1075, %v1461_v14  }
 0xcba   :  { %1077 = vset.pattern.permute.xlu1 %v1197_v1  ;;  %1078 = vset.pattern.permute.xlu0 %v1198_v2 }
 0xcbb   :  { %692 = vperm.xlu1 %1077, %v1461_v14   ;;  %699 = vperm.xlu0 %1078, %v1461_v14  }
 0xcbf   :  { %1079 = vset.pattern.permute.xlu1 %v1199_v3  ;;  %1081 = vset.pattern.permute.xlu0 %v1200_v4 }
 0xcc0   :  { %706 = vperm.xlu1 %1079, %v1461_v14   ;;  %720 = vperm.xlu0 %1081, %v1461_v14  }
 0xcc4   :  { %1080 = vset.pattern.permute.xlu1 %v1201_v5  ;;  %1083 = vset.pattern.permute.xlu0 %v1195_v61  ;;  %v681_v61 = vrot.slane %v1247_v22, 3 }
 0xcc5   :  { %713 = vperm.xlu1 %1080, %v1461_v14  }
 0xcc9   :  { %1082 = vset.pattern.permute.xlu1 %v1202_v6 }
 0xcca   :  { %727 = vperm.xlu1 %1082, %v1461_v14  }
 0xcce   :  { %1084 = vset.pattern.permute.xlu1 %v1194_v60 }
 0xd31   :  { %v686_v63 = vpop.permute.xlu1 %685  ;;  %v679_v16 = vpop.permute.xlu0 %678 }
 0xd32   :  { %v690_v37 = vmul.f32 %v688_v29, %v686_v63  ;;  %v683_v38 = vmul.f32 %v681_v61, %v679_v16  ;;  %v788_v29 = vrot.slane %v1252_v23, 2  ;;  %v816_v61 = vrot.slane %v1267_v27, 2 }
 0xd34   :  { %v733_v45 = vadd.f32 %v690_v37, %v683_v38 }
 0xd36   :  { %v693_v15 = vpop.permute.xlu1 %692  ;;  %v700_v18 = vpop.permute.xlu0 %699 }
 0xd37   :  { %v697_v33 = vmul.f32 %v695_v26, %v693_v15  ;;  %v704_v60 = vmul.f32 %v702_v28, %v700_v18  ;;  %v802_v28 = vrot.slane %v1237_v20, 2 }
 0xd39   :  { %v734_v41 = vadd.f32 %v704_v60, %v697_v33  ;;  %v823_v33 = vrot.slane %v1257_v24, 2  ;;  %v830_v60 = vrot.slane %v1262_v25, 2 }
 0xd3b   :  { %v707_v17 = vpop.permute.xlu1 %706  ;;  %v721_v36 = vpop.permute.xlu0 %720  ;;  %v737_v49 = vadd.f32 %v734_v41, %v733_v45 }
 0xd3c   :  { %v711_v42 = vmul.f32 %v709_v32, %v707_v17  ;;  %v725_v43 = vmul.f32 %v723_v34, %v721_v36 }
 0xd40   :  { %v714_v31 = vpop.permute.xlu1 %713 }
 0xd41   :  { %v718_v39 = vmul.f32 %v716_v30, %v714_v31 }
 0xd43   :  { %v735_v47 = vadd.f32 %v718_v39, %v711_v42 }
 0xd45   :  { %v728_v40 = vpop.permute.xlu1 %727 }
 0xd46   :  { %v732_v44 = vmul.f32 %v730_v35, %v728_v40 }
 0xd48   :  { %v736_v48 = vadd.f32 %v732_v44, %v725_v43 }
 0xd4a   :  { %v738_v50 = vadd.f32 %v736_v48, %v735_v47 }
 0xd4c   :  { %v739_v52 = vadd.f32 %v738_v50, %v737_v49 }
 0xd4e   :  { %v741_v55 = vrot.slane %v739_v52, 7 }
 0xd50   :  { %v743_v56 = vadd.f32 %v741_v55, %v1280_v46 }
 0xd52   :  { %1140 = vtanh.f32 %v743_v56  ;;  %v985_v59 = vmul.f32 -1.442695, %v743_v56 }
 0xd54   :  { %1142 = vpow2.f32 %v985_v59 }
 0xd5f   :  { %v1141_v58 = vpop.eup %1140 }
 0xd60   :  { %756 = vrot.lane.b32.xlu1 %v1141_v58, %s1193_s4 }
 0xd61   :  { %v1143_v53 = vpop.eup %1142 }
 0xd62   :  { %v747_v7 = vadd.f32 1.0, %v1143_v53  ;;  %v11_v53 = vld [vmem:[%s1550_s0 + $0x10] sm:$0xff] }
 0xd63   :  { %1000 = vmatpush3.msra.mxu1 %v11_v53 }
 0xd64   :  { %1144 = vrcp.f32 %v747_v7 }
 0xd71   :  { %v1145_v8 = vpop.eup %1144 }
 0xd72   :  { %v754_v13 = vmul.f32 %v1145_v8, %v752_v12  ;;  %v987_v12 = vld [vmem:[%s1550_s0 + $0x19] ss:$0 sm:$0xff] }
 0xdd2   :  { %v757_v51 = vpop.permute.xlu1 %756 }
 0xdd3   :  { %v759_v10 = vmul.f32 %v1145_v8, %v757_v51 }
 0xdd5   :  { %761 = vrot.lane.b32.xlu0 %v759_v10, %s1192_s14 }
 0xe47   :  { %v762_v63 = vpop.permute.xlu0 %761 }
 0xe48   :  { %v1491_v15 = vadd.f32 %v762_v63, %v754_v13 }
 0xe4a   :  { %1146 = vtanh.f32 %v1491_v15 }
 0xe57   :  { %v1147_v16 = vpop.eup %1146 }
 0xe58   :  { %767 = vrot.lane.b32.xlu1 %v1147_v16, %s1196_s5 }
 0xeca   :  { %v768_v17 = vpop.permute.xlu1 %767 }
 0xecb   :  { %v1495_v18 = vmul.f32 %v1145_v8, %v768_v17 }
 0xecd   :  { %785 = vperm.xlu1 %1084, %v1495_v18   ;;  %778 = vperm.xlu0 %1083, %v1495_v18  }
 0xed1   :  { %1085 = vset.pattern.permute.xlu1 %v1197_v1  ;;  %1086 = vset.pattern.permute.xlu0 %v1198_v2 }
 0xed2   :  { %792 = vperm.xlu1 %1085, %v1495_v18   ;;  %799 = vperm.xlu0 %1086, %v1495_v18  }
 0xed6   :  { %1087 = vset.pattern.permute.xlu1 %v1199_v3  ;;  %1089 = vset.pattern.permute.xlu0 %v1200_v4  ;;  %v795_v4 = vrot.slane %v1232_v19, 2 }
 0xed7   :  { %806 = vperm.xlu1 %1087, %v1495_v18   ;;  %820 = vperm.xlu0 %1089, %v1495_v18  }
 0xedb   :  { %1088 = vset.pattern.permute.xlu1 %v1201_v5  ;;  %1091 = vset.pattern.permute.xlu0 %v1202_v6  ;;  %v781_v5 = vrot.slane %v1247_v22, 2 }
 0xedc   :  { %813 = vperm.xlu1 %1088, %v1495_v18  }
 0xee0   :  { %1090 = vset.pattern.permute.xlu1 %v1202_v6  ;;  %v809_v6 = vrot.slane %v1242_v21, 2 }
 0xee1   :  { %827 = vperm.xlu1 %1090, %v1495_v18  }
 0xf48   :  { %v786_v1 = vpop.permute.xlu1 %785  ;;  %v779_v11 = vpop.permute.xlu0 %778 }
 0xf49   :  { %v790_v35 = vmul.f32 %v788_v29, %v786_v1  ;;  %v783_v19 = vmul.f32 %v781_v5, %v779_v11 }
 0xf4b   :  { %v833_v39 = vadd.f32 %v790_v35, %v783_v19 }
 0xf4d   :  { %v793_v2 = vpop.permute.xlu1 %792  ;;  %v800_v26 = vpop.permute.xlu0 %799 }
 0xf4e   :  { %v797_v31 = vmul.f32 %v795_v4, %v793_v2  ;;  %v804_v32 = vmul.f32 %v802_v28, %v800_v26 }
 0xf50   :  { %v834_v37 = vadd.f32 %v804_v32, %v797_v31 }
 0xf52   :  { %v807_v3 = vpop.permute.xlu1 %806  ;;  %v821_v34 = vpop.permute.xlu0 %820  ;;  %v837_v41 = vadd.f32 %v834_v37, %v833_v39 }
 0xf53   :  { %v811_v23 = vmul.f32 %v809_v6, %v807_v3  ;;  %v825_v38 = vmul.f32 %v823_v33, %v821_v34 }
 0xf57   :  { %v814_v30 = vpop.permute.xlu1 %813 }
 0xf58   :  { %v818_v36 = vmul.f32 %v816_v61, %v814_v30 }
 0xf5a   :  { %v835_v27 = vadd.f32 %v818_v36, %v811_v23 }
 0xf5c   :  { %v828_v20 = vpop.permute.xlu1 %827 }
 0xf5d   :  { %v832_v22 = vmul.f32 %v830_v60, %v828_v20 }
 0xf5f   :  { %v836_v40 = vadd.f32 %v832_v22, %v825_v38 }
 0xf61   :  { %v838_v21 = vadd.f32 %v836_v40, %v835_v27 }
 0xf63   :  { %v839_v42 = vadd.f32 %v838_v21, %v837_v41 }
 0xf65   :  { %v841_v43 = vrot.slane %v839_v42, 7 }
 0xf67   :  { %v843_v24 = vadd.f32 %v841_v43, %v1280_v46  ;;  %v852_v46 = vrot.slane %v1491_v15, 7 }
 0xf69   :  { %1148 = vtanh.f32 %v843_v24  ;;  %v986_v44 = vmul.f32 -1.442695, %v843_v24 }
 0xf6b   :  { %1150 = vpow2.f32 %v986_v44 }
 0xf76   :  { %v1149_v25 = vpop.eup %1148 }
 0xf77   :  { %856 = vrot.lane.b32.xlu1 %v1149_v25, %s1193_s4 }
 0xf78   :  { %v1151_v45 = vpop.eup %1150 }
 0xf79   :  { %v847_v47 = vadd.f32 1.0, %v1151_v45 }
 0xf7b   :  { %1152 = vrcp.f32 %v847_v47 }
 0xf88   :  { %v1153_v48 = vpop.eup %1152 }
 0xf89   :  { %v854_v52 = vmul.f32 %v1153_v48, %v852_v46 }
 0xfe9   :  { %v857_v49 = vpop.permute.xlu1 %856 }
 0xfea   :  { %v859_v50 = vmul.f32 %v1153_v48, %v857_v49 }
 0xfec   :  { %861 = vrot.lane.b32.xlu0 %v859_v50, %s1192_s14 }
 0xff0   :  { %180 = vrot.lane.b32.xlu0 %v1291_v0, %s1203_s6 }
 0xff4   :  { %372 = vrot.lane.b32.xlu0 %v1359_v57, %s1203_s6 }
 0xff8   :  { %572 = vrot.lane.b32.xlu0 %v1427_v9, %s1203_s6 }
 0xffc   :  { %772 = vrot.lane.b32.xlu0 %v1495_v18, %s1203_s6 }
0x105e   :  { %v862_v55 = vpop.permute.xlu0 %861 }
0x105f   :  { %v864_v56 = vadd.f32 %v862_v55, %v854_v52 }
0x1061   :  { %1154 = vtanh.f32 %v864_v56 }
0x1062   :  { %v181_v58 = vpop.permute.xlu0 %180 }
0x1063   :  { %184 = vst.msk [vmem:[#allocation2] sm:$0x1] %vm183_vm2, %v181_v58 }
0x1066   :  { %v373_v0 = vpop.permute.xlu0 %372 }
0x1067   :  { %376 = vst.msk [vmem:[#allocation2] sm:$0x4] %vm375_vm3, %v373_v0 }
0x106a   :  { %v573_v57 = vpop.permute.xlu0 %572 }
0x106b   :  { %576 = vst.msk [vmem:[#allocation2] sm:$0x10] %vm575_vm4, %v573_v57 }
0x106e   :  { %v1155_v9 = vpop.eup %1154  ;;  %v773_v59 = vpop.permute.xlu0 %772 }
0x106f   :  { %776 = vst.msk [vmem:[#allocation2] sm:$0x40] %vm775_vm5, %v773_v59  ;;  %867 = vrot.lane.b32.xlu1 %v1155_v9, %s1196_s5 }
0x1073   :  { %264 = vrot.lane.b32.xlu1 %v1325_v54, %s1203_s6 }
0x1077   :  { %472 = vrot.lane.b32.xlu1 %v1393_v62, %s1203_s6 }
0x107b   :  { %672 = vrot.lane.b32.xlu1 %v1461_v14, %s1203_s6 }
0x10e1   :  { %v868_v7 = vpop.permute.xlu1 %867 }
0x10e2   :  { %v870_v8 = vmul.f32 %v1153_v48, %v868_v7 }
0x10e4   :  { %872 = vrot.lane.b32.xlu1 %v870_v8, %s1203_s6 }
0x10e5   :  { %v265_v51 = vpop.permute.xlu1 %264 }
0x10e6   :  { %268 = vst.msk [vmem:[#allocation2] sm:$0x2] %vm267_vm6, %v265_v51 }
0x10e9   :  { %v473_v54 = vpop.permute.xlu1 %472 }
0x10ea   :  { %476 = vst.msk [vmem:[#allocation2] sm:$0x8] %vm475_vm7, %v473_v54 }
0x10ed   :  { %v673_v62 = vpop.permute.xlu1 %672 }
0x10ee   :  { %676 = vst.msk [vmem:[#allocation2] sm:$0x20] %vm675_vm8, %v673_v62 }
0x1156   :  { %v873_v14 = vpop.permute.xlu1 %872 }
0x1157   :  { %876 = vst.msk [vmem:[#allocation2] sm:$0x80] %vm875_vm9, %v873_v14 }
0x115e   :  { %v877_v10 = vld [vmem:[#allocation2] sm:$0xff] }
0x115f   :  { %1002 = vmatmul.mubr.msk.f32.vlgmr.msra.gmra.mxu1 %vm28_vm0, %v877_v10 }
0x121f   :  { %v951_v13 = vpop.f32.mrf.mxu1 }
0x1220   :  { %v952_v63 = vadd.f32 %v987_v12, %v951_v13 }
0x1221   :  { %v1003_v15 = vpop.f32.mrf.mxu1 }
0x1222   :  { %v989_v16 = vmul.f32 -1.442695, %v952_v63 }
0x1224   :  { %1156 = vpow2.f32 %v989_v16 }
0x1231   :  { %v1157_v17 = vpop.eup %1156 }
0x1232   :  { %v958_v18 = vadd.f32 1.0, %v1157_v17 }
0x1234   :  { %1158 = vrcp.f32 %v958_v18 }
0x1241   :  { %v1159_v1 = vpop.eup %1158 }
0x1242   :  { %v961_v2 = vmul.f32 2.0, %v1159_v1 }
0x1244   :  { %962 = vst [vmem:[#allocation3] sm:$0xff] %v961_v2 }
0x1245   :  { %1171 = shalt.err (!%p1168_p4)
}
0x1246   :  { %972 = dma.vmem_to_hbm [thread:$0]  %s970_s12, 128, %s1551_s1, [#allocation4]  }
0x1247   :  { %1180 = dma.done.wait [#allocation4], 128  }
0x1248   :  { %1181 = vsyncadd [#allocation4], 4294967168 }
0x1249   :  { %976 = vsyncpa [#allocation4], 1 }

</bundles_post_ra>
